<compile_context>
chip_gen: v7x
topology: tpu7x:2x2x1
jax: 0.10.0
libtpu: 0.0.40
codegen_flags: <defaults>
</compile_context>

<pallas_src>
import functools
import math

import jax
import jax.numpy as jnp
import numpy as np
from jax.experimental import pallas as pl
from jax.experimental.pallas import tpu as pltpu


def _round_up(x, m):
    return ((x + m - 1) // m) * m


def _pick_tb(n, tb):
    tb = max(8, min(_round_up(tb, 8), _round_up(n, 8)))
    # prefer >= 2 grid steps so both v7x TensorCores get work
    if _round_up(n, tb) // tb < 2 and n > 8:
        tb = max(8, _round_up((n + 1) // 2, 8))
    return tb


# --------------------------------- kernel ---------------------------------
def _hgt_layer_kernel(T, R, Fp, tb, deg, inv_sqrt_dk,
                      h_all_ref, h_dst_ref, src_ref, ntd_ref, nts_ref, et_ref,
                      kvw_ref, qw_ref, aw_ref, ratt_ref, rmsg_ref,
                      pri_ref, alpha_ref, out_ref):
    rows = tb * deg
    n_all = h_all_ref.shape[0]

    h_all = h_all_ref[...]                      # (n_all, f_in) bf16, resident across grid
    h_dst = h_dst_ref[...]                      # (tb, f_in)    bf16
    src = src_ref[...]                          # (rows, 1) int32 source node per edge
    ntd = ntd_ref[...]                          # (tb, 1)   int32 dst node type
    nts = nts_ref[...]                          # (rows, 1) int32 src node type
    et = et_ref[...]                            # (rows, 1) int32 relation type

    # ---- in-kernel gather of source features: exact one-hot selection on the MXU ----
    cols = jax.lax.broadcasted_iota(jnp.int32, (rows, n_all), 1)
    onehot = (cols == src).astype(jnp.bfloat16)                               # (rows, n_all)
    h_src = jnp.dot(onehot, h_all,
                    preferred_element_type=jnp.float32).astype(jnp.bfloat16)  # (rows, f_in)

    # ---- message_func: stacked per-type projections, k|v interleaved per type ----
    kv_all = jnp.dot(h_src, kvw_ref[...], preferred_element_type=jnp.float32)  # (rows, T*2*Fp)
    q_all = jnp.dot(h_dst, qw_ref[...], preferred_element_type=jnp.float32)    # (tb,   T*Fp)

    kv = jnp.zeros((rows, 2 * Fp), jnp.float32)
    q = jnp.zeros((tb, Fp), jnp.float32)
    for t in range(T):
        s_t = (nts == t).astype(jnp.float32)                                   # (rows, 1)
        d_t = (ntd == t).astype(jnp.float32)                                   # (tb, 1)
        kv = kv + s_t * kv_all[:, t * 2 * Fp:(t + 1) * 2 * Fp]
        q = q + d_t * q_all[:, t * Fp:(t + 1) * Fp]
    k = kv[:, :Fp]
    v = kv[:, Fp:]

    # ---- stacked per-relation transforms ----
    k2_all = jnp.dot(k.astype(jnp.bfloat16), ratt_ref[...],
                     preferred_element_type=jnp.float32)                       # (rows, R*Fp)
    v2_all = jnp.dot(v.astype(jnp.bfloat16), rmsg_ref[...],
                     preferred_element_type=jnp.float32)
    k2 = jnp.zeros((rows, Fp), jnp.float32)
    v2 = jnp.zeros((rows, Fp), jnp.float32)
    pri_e = jnp.zeros((rows, 1), jnp.float32)
    for r in range(R):
        e_r = (et == r).astype(jnp.float32)                                    # (rows, 1)
        k2 = k2 + e_r * k2_all[:, r * Fp:(r + 1) * Fp]
        v2 = v2 + e_r * v2_all[:, r * Fp:(r + 1) * Fp]
        pri_e = pri_e + e_r * pri_ref[r]

    # ---- reduce_func: lane-dense edge softmax over the deg incoming edges ----
    k2_3 = k2.reshape(tb, deg, Fp)
    v2_3 = v2.reshape(tb, deg, Fp)
    attn = jnp.sum(k2_3 * q[:, None, :], axis=-1)                              # (tb, deg)
    attn = attn * pri_e.reshape(tb, deg) * inv_sqrt_dk
    attn = attn - jnp.max(attn, axis=1, keepdims=True)
    p = jnp.exp(attn)
    p = p * pl.reciprocal(jnp.sum(p, axis=1, keepdims=True), approx=True)      # (tb, deg)
    t_node = jnp.sum(p[:, :, None] * v2_3, axis=1)                             # (tb, Fp)

    # ---- update_func: per-node-type output projection + sigmoid skip gate ----
    trans_all = jnp.dot(t_node.astype(jnp.bfloat16), aw_ref[...],
                        preferred_element_type=jnp.float32)                    # (tb, T*Fp)
    trans = jnp.zeros((tb, Fp), jnp.float32)
    alpha = jnp.zeros((tb, 1), jnp.float32)
    for t in range(T):
        d_t = (ntd == t).astype(jnp.float32)
        trans = trans + d_t * trans_all[:, t * Fp:(t + 1) * Fp]
        alpha = alpha + d_t * alpha_ref[t]
    out_ref[...] = trans * alpha


# --------------------------------- wrapper ---------------------------------
def _pad_stack(w, in_dim, out_pad):
    """(G, din, dout) -> zero-padded (G, in_dim, out_pad) f32."""
    g, din, dout = w.shape
    return jnp.pad(w.astype(jnp.float32), ((0, 0), (0, in_dim - din), (0, out_pad - dout)))


def _flatten_groups(w):
    """(G, din, dout) -> (din, G*dout): group-stacked along the output/lane axis."""
    g, din, dout = w.shape
    return jnp.transpose(w, (1, 0, 2)).reshape(din, g * dout)


def hgt_layer_pallas(h, src_idx, etype, ntype, params, tb=128):
    """One HGTLayer_simplified forward ('naive' flag) with fixed in-degree graph.

    Returns (n, Fp) f32 with the feature dim zero-padded to a multiple of 128 so the
    output block is lane-dense; the caller strips the padding.
    """
    n, f_in = h.shape
    deg = src_idx.shape[1]
    T, f_in_w, f_out = params["k_weight"].shape
    R = params["relation_att"].shape[0]
    assert f_in == f_in_w, "strip feature padding before calling (see hgt_forward_pallas)"
    Fp = _round_up(f_out, 128)
    inv_sqrt_dk = 1.0 / math.sqrt(f_out)

    tb = _pick_tb(n, tb)
    n_pad = _round_up(n, tb)
    pad_n = n_pad - n

    # bf16 features feed the MXU at full rate on v5e/v6e/v7x and halve HBM/VMEM bytes.
    h_p = jnp.pad(h.astype(jnp.bfloat16), ((0, pad_n), (0, 0)))          # (n_pad, f_in)
    ntype_p = jnp.pad(ntype.astype(jnp.int32), (0, pad_n))
    src_p = jnp.pad(src_idx.astype(jnp.int32), ((0, pad_n), (0, 0)))
    et_p = jnp.pad(etype.astype(jnp.int32), ((0, pad_n), (0, 0)))

    # resident-h gather path: the whole (bf16) feature table stays in VMEM.
    assert n_pad * f_in * 2 <= 8 * 1024 * 1024, "graph too large for resident-h gather"
    # TODO(synk): for graphs whose features do not fit VMEM, scalar-prefetch src_idx and
    #             DMA the tb*deg source rows per tile with make_async_copy double-buffering.

    src_flat = src_p.reshape(-1, 1)                                      # (n_pad*deg, 1)
    nt_src = ntype_p[src_p.reshape(-1)].reshape(-1, 1)                   # tiny int gather in JAX
    nt_dst = ntype_p.reshape(-1, 1)                                      # (n_pad, 1)
    et_flat = et_p.reshape(-1, 1)                                        # (n_pad*deg, 1)

    # stacked, zero-padded bf16 weights (every selected chunk is 128-aligned)
    kw = _pad_stack(params["k_weight"], f_in, Fp)
    vw = _pad_stack(params["v_weight"], f_in, Fp)
    kvw_s = _flatten_groups(jnp.concatenate([kw, vw], axis=2)).astype(jnp.bfloat16)  # (f_in, T*2*Fp)
    qw_s = _flatten_groups(_pad_stack(params["q_weight"], f_in, Fp)).astype(jnp.bfloat16)
    aw_s = _flatten_groups(_pad_stack(params["a_weight"], Fp, Fp)).astype(jnp.bfloat16)
    ratt_s = _flatten_groups(_pad_stack(params["relation_att"], Fp, Fp)).astype(jnp.bfloat16)
    rmsg_s = _flatten_groups(_pad_stack(params["relation_msg"], Fp, Fp)).astype(jnp.bfloat16)

    pri = params["relation_pri"].reshape(-1).astype(jnp.float32)         # (R,) SMEM table
    alpha_tab = jax.nn.sigmoid(params["skip"].astype(jnp.float32))       # (T,) SMEM table

    kernel = functools.partial(_hgt_layer_kernel, T, R, Fp, tb, deg, inv_sqrt_dk)

    def full2(shape):
        return pl.BlockSpec(shape, lambda i: (0, 0))

    # TODO(synk): on v7x (64 MiB VMEM) add pipeline_mode=pl.Buffered(1) to the constant
    #             weight specs and shrink tb; on v5e/v6e raise vmem_limit_bytes (~96 MiB)
    #             and tb for big graphs.
    out = pl.pallas_call(
        kernel,
        out_shape=jax.ShapeDtypeStruct((n_pad, Fp), jnp.float32),
        grid=(n_pad // tb,),
        in_specs=[
            full2((n_pad, f_in)),                                   # h resident (for gather)
            pl.BlockSpec((tb, f_in), lambda i: (i, 0)),             # h_dst tile
            pl.BlockSpec((tb * deg, 1), lambda i: (i, 0)),          # src node index (int32)
            pl.BlockSpec((tb, 1), lambda i: (i, 0)),                # dst node type (int32)
            pl.BlockSpec((tb * deg, 1), lambda i: (i, 0)),          # src node type (int32)
            pl.BlockSpec((tb * deg, 1), lambda i: (i, 0)),          # edge type (int32)
            full2((f_in, 2 * T * Fp)),                              # k|v weights, interleaved
            full2((f_in, T * Fp)),                                  # q weights, stacked
            full2((Fp, T * Fp)),                                    # a weights, stacked
            full2((Fp, R * Fp)),                                    # relation_att, stacked
            full2((Fp, R * Fp)),                                    # relation_msg, stacked
            pl.BlockSpec(memory_space=pltpu.MemorySpace.SMEM),      # relation_pri table
            pl.BlockSpec(memory_space=pltpu.MemorySpace.SMEM),      # sigmoid(skip) table
        ],
        out_specs=pl.BlockSpec((tb, Fp), lambda i: (i, 0)),
        compiler_params=pltpu.CompilerParams(
            dimension_semantics=("parallel",),
            vmem_limit_bytes=48 * 1024 * 1024),
    )(h_p, h_p, src_flat, nt_dst, nt_src, et_flat,
      kvw_s, qw_s, aw_s, ratt_s, rmsg_s, pri, alpha_tab)
    return out[:n]                                                  # (n, Fp), lane-padded


def hgt_forward_pallas(h, src_idx, etype, ntype, params0, params1, tb=128):
    f_out0 = params0["a_weight"].shape[2]
    f_out1 = params1["a_weight"].shape[2]
    h1 = hgt_layer_pallas(h, src_idx, etype, ntype, params0, tb=tb)[:, :f_out0]
    h2 = hgt_layer_pallas(h1, src_idx, etype, ntype, params1, tb=tb)
    return h2[:, :f_out1]


# ------------- pure-JAX reference (torch semantics, bf16 MXU operands) -------------
def hgt_layer_ref(h, src_idx, etype, ntype, params):
    bf16 = jnp.bfloat16
    f_out = params["k_weight"].shape[2]
    sqrt_dk = math.sqrt(f_out)
    hq = h.astype(bf16)
    h_src = hq[src_idx]                                                  # (N, D, Fin)
    kw = params["k_weight"].astype(bf16)[ntype[src_idx]]
    vw = params["v_weight"].astype(bf16)[ntype[src_idx]]
    qw = params["q_weight"].astype(bf16)[ntype]
    k = jnp.einsum("ndi,ndio->ndo", h_src, kw, preferred_element_type=jnp.float32)
    v = jnp.einsum("ndi,ndio->ndo", h_src, vw, preferred_element_type=jnp.float32)
    q = jnp.einsum("ni,nio->no", hq, qw, preferred_element_type=jnp.float32)
    ratt = params["relation_att"].astype(bf16)[etype]
    rmsg = params["relation_msg"].astype(bf16)[etype]
    k = jnp.einsum("ndo,ndop->ndp", k.astype(bf16), ratt, preferred_element_type=jnp.float32)
    v = jnp.einsum("ndo,ndop->ndp", v.astype(bf16), rmsg, preferred_element_type=jnp.float32)
    attn = (jnp.sum(k * q[:, None, :], axis=-1, keepdims=True)
            * params["relation_pri"][etype] / sqrt_dk)                   # (N, D, 1)
    p = jax.nn.softmax(attn, axis=1)
    t = jnp.sum(p * v, axis=1)                                           # (N, Fout)
    alpha = jax.nn.sigmoid(params["skip"][ntype])                        # (N,)
    aw = params["a_weight"].astype(bf16)[ntype]
    trans = jnp.einsum("no,nop->np", t.astype(bf16), aw, preferred_element_type=jnp.float32)
    return trans * alpha[:, None]


def init_params(key, in_dim, out_dim, num_ntypes, num_rels):
    ks = jax.random.split(key, 6)
    return {
        "k_weight": jax.random.uniform(ks[0], (num_ntypes, in_dim, out_dim), jnp.float32),
        "q_weight": jax.random.uniform(ks[1], (num_ntypes, in_dim, out_dim), jnp.float32),
        "v_weight": jax.random.uniform(ks[2], (num_ntypes, in_dim, out_dim), jnp.float32),
        "a_weight": jax.random.uniform(ks[3], (num_ntypes, out_dim, out_dim), jnp.float32),
        "relation_pri": jnp.ones((num_rels, 1), jnp.float32),
        "relation_att": jax.random.uniform(ks[4], (num_rels, out_dim, out_dim), jnp.float32),
        "relation_msg": jax.random.uniform(ks[5], (num_rels, out_dim, out_dim), jnp.float32),
        "skip": jnp.ones((num_ntypes,), jnp.float32),
    }


if __name__ == "__main__":
    key = jax.random.PRNGKey(0)
    n_nodes, in_deg = 16, 4
    in_dim, h_dim, out_dim = 32, 32, 32
    num_ntypes, num_rels = 3, 3

    k1, k2, k3, k4, k5, k6 = jax.random.split(key, 6)
    h = 0.01 * jax.random.normal(k1, (n_nodes, in_dim), jnp.float32)
    src_idx = jax.random.randint(k2, (n_nodes, in_deg), 0, n_nodes)
    etype = jax.random.randint(k3, (n_nodes, in_deg), 0, num_rels)
    ntype = jax.random.randint(k4, (n_nodes,), 0, num_ntypes)

    params0 = init_params(k5, in_dim, h_dim, num_ntypes, num_rels)
    params1 = init_params(k6, h_dim, out_dim, num_ntypes, num_rels)

    out = hgt_forward_pallas(h, src_idx, etype, ntype, params0, params1)
    out = jax.block_until_ready(out)

    ref = hgt_layer_ref(h, src_idx, etype, ntype, params0)
    ref = hgt_layer_ref(ref, src_idx, etype, ntype, params1)
    # bf16 MXU operands + approx reciprocal in the edge softmax -> loosened tolerance.
    np.testing.assert_allclose(np.asarray(out), np.asarray(ref), rtol=5e-2, atol=5e-2)

    print("KERNEL_OK")
</pallas_src>

<mosaic_0001>
module attributes {stable_mosaic.version = 11 : i64} {
  func.func @_hgt_layer_kernel(%arg0: i32, %arg1: memref<16x32xbf16, #tpu.memory_space<vmem>>, %arg2: memref<8x32xbf16, #tpu.memory_space<vmem>>, %arg3: memref<32x1xi32, #tpu.memory_space<vmem>>, %arg4: memref<8x1xi32, #tpu.memory_space<vmem>>, %arg5: memref<32x1xi32, #tpu.memory_space<vmem>>, %arg6: memref<32x1xi32, #tpu.memory_space<vmem>>, %arg7: memref<32x768xbf16, #tpu.memory_space<vmem>>, %arg8: memref<32x384xbf16, #tpu.memory_space<vmem>>, %arg9: memref<128x384xbf16, #tpu.memory_space<vmem>>, %arg10: memref<128x384xbf16, #tpu.memory_space<vmem>>, %arg11: memref<128x384xbf16, #tpu.memory_space<vmem>>, %arg12: memref<3xf32, #tpu.memory_space<smem>>, %arg13: memref<3xf32, #tpu.memory_space<smem>>, %arg14: memref<8x128xf32, #tpu.memory_space<vmem>>) attributes {dimension_semantics = [#tpu.dimension_semantics<parallel>], iteration_bounds = array<i64: 2>, scalar_prefetch = 0 : i64, scratch_operands = 0 : i64, tpu.core_type = #tpu.core_type<tc>, window_params = [{pipeline_mode = #tpu.pipeline_mode<synchronous>, transform_indices = @transform_0, window_bounds = array<i64: 16, 32>}, {transform_indices = @transform_1, window_bounds = array<i64: 8, 32>}, {transform_indices = @transform_2, window_bounds = array<i64: 32, 1>}, {transform_indices = @transform_3, window_bounds = array<i64: 8, 1>}, {transform_indices = @transform_4, window_bounds = array<i64: 32, 1>}, {transform_indices = @transform_5, window_bounds = array<i64: 32, 1>}, {pipeline_mode = #tpu.pipeline_mode<synchronous>, transform_indices = @transform_6, window_bounds = array<i64: 32, 768>}, {pipeline_mode = #tpu.pipeline_mode<synchronous>, transform_indices = @transform_7, window_bounds = array<i64: 32, 384>}, {pipeline_mode = #tpu.pipeline_mode<synchronous>, transform_indices = @transform_8, window_bounds = array<i64: 128, 384>}, {pipeline_mode = #tpu.pipeline_mode<synchronous>, transform_indices = @transform_9, window_bounds = array<i64: 128, 384>}, {pipeline_mode = #tpu.pipeline_mode<synchronous>, transform_indices = @transform_10, window_bounds = array<i64: 128, 384>}, {transform_indices = @transform_11, window_bounds = array<i64: 3>}, {transform_indices = @transform_12, window_bounds = array<i64: 3>}, {transform_indices = @transform_13, window_bounds = array<i64: 8, 128>}]} {
    %c0 = arith.constant 0 : index
    %c0_0 = arith.constant 0 : index
    %0 = vector.load %arg1[%c0, %c0_0] : memref<16x32xbf16, #tpu.memory_space<vmem>>, vector<16x32xbf16>
    %c0_1 = arith.constant 0 : index
    %c0_2 = arith.constant 0 : index
    %1 = vector.load %arg2[%c0_1, %c0_2] : memref<8x32xbf16, #tpu.memory_space<vmem>>, vector<8x32xbf16>
    %c0_3 = arith.constant 0 : index
    %c0_4 = arith.constant 0 : index
    %2 = vector.load %arg3[%c0_3, %c0_4] : memref<32x1xi32, #tpu.memory_space<vmem>>, vector<32x1xi32>
    %c0_5 = arith.constant 0 : index
    %c0_6 = arith.constant 0 : index
    %3 = vector.load %arg4[%c0_5, %c0_6] : memref<8x1xi32, #tpu.memory_space<vmem>>, vector<8x1xi32>
    %c0_7 = arith.constant 0 : index
    %c0_8 = arith.constant 0 : index
    %4 = vector.load %arg5[%c0_7, %c0_8] : memref<32x1xi32, #tpu.memory_space<vmem>>, vector<32x1xi32>
    %c0_9 = arith.constant 0 : index
    %c0_10 = arith.constant 0 : index
    %5 = vector.load %arg6[%c0_9, %c0_10] : memref<32x1xi32, #tpu.memory_space<vmem>>, vector<32x1xi32>
    %6 = tpu.iota {dimensions = array<i32: 1>} : vector<32x16xi32>
    %7 = vector.broadcast %2 : vector<32x1xi32> to vector<32x16xi32>
    %8 = arith.cmpi eq, %6, %7 : vector<32x16xi32>
    %9 = arith.extui %8 : vector<32x16xi1> to vector<32x16xi32>
    %10 = arith.sitofp %9 : vector<32x16xi32> to vector<32x16xf32>
    %11 = arith.truncf %10 : vector<32x16xf32> to vector<32x16xbf16>
    %cst = arith.constant dense<0.000000e+00> : vector<32x32xf32>
    %12 = tpu.matmul %11, %0, %cst {dimension_numbers = #tpu.dot_dimension_numbers<[1], [0], [0], [1], [0, 0, 1, 1], [], []>} : vector<32x16xbf16>, vector<16x32xbf16>, vector<32x32xf32> -> vector<32x32xf32>
    %13 = arith.truncf %12 : vector<32x32xf32> to vector<32x32xbf16>
    %c0_11 = arith.constant 0 : index
    %c0_12 = arith.constant 0 : index
    %14 = vector.load %arg7[%c0_11, %c0_12] : memref<32x768xbf16, #tpu.memory_space<vmem>>, vector<32x768xbf16>
    %cst_13 = arith.constant dense<0.000000e+00> : vector<32x768xf32>
    %15 = tpu.matmul %13, %14, %cst_13 {dimension_numbers = #tpu.dot_dimension_numbers<[1], [0], [0], [1], [0, 0, 1, 1], [], []>} : vector<32x32xbf16>, vector<32x768xbf16>, vector<32x768xf32> -> vector<32x768xf32>
    %c0_14 = arith.constant 0 : index
    %c0_15 = arith.constant 0 : index
    %16 = vector.load %arg8[%c0_14, %c0_15] : memref<32x384xbf16, #tpu.memory_space<vmem>>, vector<32x384xbf16>
    %cst_16 = arith.constant dense<0.000000e+00> : vector<8x384xf32>
    %17 = tpu.matmul %1, %16, %cst_16 {dimension_numbers = #tpu.dot_dimension_numbers<[1], [0], [0], [1], [0, 0, 1, 1], [], []>} : vector<8x32xbf16>, vector<32x384xbf16>, vector<8x384xf32> -> vector<8x384xf32>
    %cst_17 = arith.constant 0.000000e+00 : f32
    %18 = vector.broadcast %cst_17 : f32 to vector<32x256xf32>
    %cst_18 = arith.constant 0.000000e+00 : f32
    %19 = vector.broadcast %cst_18 : f32 to vector<8x128xf32>
    %c0_i32 = arith.constant 0 : i32
    %20 = vector.broadcast %c0_i32 : i32 to vector<32x1xi32>
    %21 = arith.cmpi eq, %4, %20 : vector<32x1xi32>
    %22 = arith.extui %21 : vector<32x1xi1> to vector<32x1xi32>
    %23 = arith.sitofp %22 : vector<32x1xi32> to vector<32x1xf32>
    %c0_i32_19 = arith.constant 0 : i32
    %24 = vector.broadcast %c0_i32_19 : i32 to vector<8x1xi32>
    %25 = arith.cmpi eq, %3, %24 : vector<8x1xi32>
    %26 = arith.extui %25 : vector<8x1xi1> to vector<8x1xi32>
    %27 = arith.sitofp %26 : vector<8x1xi32> to vector<8x1xf32>
    %28 = vector.extract_strided_slice %15 {offsets = [0, 0], sizes = [32, 256], strides = [1, 1]} : vector<32x768xf32> to vector<32x256xf32>
    %29 = vector.broadcast %23 : vector<32x1xf32> to vector<32x256xf32>
    %30 = arith.mulf %29, %28 : vector<32x256xf32>
    %31 = arith.addf %18, %30 : vector<32x256xf32>
    %32 = vector.extract_strided_slice %17 {offsets = [0, 0], sizes = [8, 128], strides = [1, 1]} : vector<8x384xf32> to vector<8x128xf32>
    %33 = vector.broadcast %27 : vector<8x1xf32> to vector<8x128xf32>
    %34 = arith.mulf %33, %32 : vector<8x128xf32>
    %35 = arith.addf %19, %34 : vector<8x128xf32>
    %c1_i32 = arith.constant 1 : i32
    %36 = vector.broadcast %c1_i32 : i32 to vector<32x1xi32>
    %37 = arith.cmpi eq, %4, %36 : vector<32x1xi32>
    %38 = arith.extui %37 : vector<32x1xi1> to vector<32x1xi32>
    %39 = arith.sitofp %38 : vector<32x1xi32> to vector<32x1xf32>
    %c1_i32_20 = arith.constant 1 : i32
    %40 = vector.broadcast %c1_i32_20 : i32 to vector<8x1xi32>
    %41 = arith.cmpi eq, %3, %40 : vector<8x1xi32>
    %42 = arith.extui %41 : vector<8x1xi1> to vector<8x1xi32>
    %43 = arith.sitofp %42 : vector<8x1xi32> to vector<8x1xf32>
    %44 = vector.extract_strided_slice %15 {offsets = [0, 256], sizes = [32, 256], strides = [1, 1]} : vector<32x768xf32> to vector<32x256xf32>
    %45 = vector.broadcast %39 : vector<32x1xf32> to vector<32x256xf32>
    %46 = arith.mulf %45, %44 : vector<32x256xf32>
    %47 = arith.addf %31, %46 : vector<32x256xf32>
    %48 = vector.extract_strided_slice %17 {offsets = [0, 128], sizes = [8, 128], strides = [1, 1]} : vector<8x384xf32> to vector<8x128xf32>
    %49 = vector.broadcast %43 : vector<8x1xf32> to vector<8x128xf32>
    %50 = arith.mulf %49, %48 : vector<8x128xf32>
    %51 = arith.addf %35, %50 : vector<8x128xf32>
    %c2_i32 = arith.constant 2 : i32
    %52 = vector.broadcast %c2_i32 : i32 to vector<32x1xi32>
    %53 = arith.cmpi eq, %4, %52 : vector<32x1xi32>
    %54 = arith.extui %53 : vector<32x1xi1> to vector<32x1xi32>
    %55 = arith.sitofp %54 : vector<32x1xi32> to vector<32x1xf32>
    %c2_i32_21 = arith.constant 2 : i32
    %56 = vector.broadcast %c2_i32_21 : i32 to vector<8x1xi32>
    %57 = arith.cmpi eq, %3, %56 : vector<8x1xi32>
    %58 = arith.extui %57 : vector<8x1xi1> to vector<8x1xi32>
    %59 = arith.sitofp %58 : vector<8x1xi32> to vector<8x1xf32>
    %60 = vector.extract_strided_slice %15 {offsets = [0, 512], sizes = [32, 256], strides = [1, 1]} : vector<32x768xf32> to vector<32x256xf32>
    %61 = vector.broadcast %55 : vector<32x1xf32> to vector<32x256xf32>
    %62 = arith.mulf %61, %60 : vector<32x256xf32>
    %63 = arith.addf %47, %62 : vector<32x256xf32>
    %64 = vector.extract_strided_slice %17 {offsets = [0, 256], sizes = [8, 128], strides = [1, 1]} : vector<8x384xf32> to vector<8x128xf32>
    %65 = vector.broadcast %59 : vector<8x1xf32> to vector<8x128xf32>
    %66 = arith.mulf %65, %64 : vector<8x128xf32>
    %67 = arith.addf %51, %66 : vector<8x128xf32>
    %68 = vector.extract_strided_slice %63 {offsets = [0, 0], sizes = [32, 128], strides = [1, 1]} : vector<32x256xf32> to vector<32x128xf32>
    %69 = vector.extract_strided_slice %63 {offsets = [0, 128], sizes = [32, 128], strides = [1, 1]} : vector<32x256xf32> to vector<32x128xf32>
    %70 = arith.truncf %68 : vector<32x128xf32> to vector<32x128xbf16>
    %c0_22 = arith.constant 0 : index
    %c0_23 = arith.constant 0 : index
    %71 = vector.load %arg10[%c0_22, %c0_23] : memref<128x384xbf16, #tpu.memory_space<vmem>>, vector<128x384xbf16>
    %cst_24 = arith.constant dense<0.000000e+00> : vector<32x384xf32>
    %72 = tpu.matmul %70, %71, %cst_24 {dimension_numbers = #tpu.dot_dimension_numbers<[1], [0], [0], [1], [0, 0, 1, 1], [], []>} : vector<32x128xbf16>, vector<128x384xbf16>, vector<32x384xf32> -> vector<32x384xf32>
    %73 = arith.truncf %69 : vector<32x128xf32> to vector<32x128xbf16>
    %c0_25 = arith.constant 0 : index
    %c0_26 = arith.constant 0 : index
    %74 = vector.load %arg11[%c0_25, %c0_26] : memref<128x384xbf16, #tpu.memory_space<vmem>>, vector<128x384xbf16>
    %cst_27 = arith.constant dense<0.000000e+00> : vector<32x384xf32>
    %75 = tpu.matmul %73, %74, %cst_27 {dimension_numbers = #tpu.dot_dimension_numbers<[1], [0], [0], [1], [0, 0, 1, 1], [], []>} : vector<32x128xbf16>, vector<128x384xbf16>, vector<32x384xf32> -> vector<32x384xf32>
    %cst_28 = arith.constant 0.000000e+00 : f32
    %76 = vector.broadcast %cst_28 : f32 to vector<32x128xf32>
    %cst_29 = arith.constant 0.000000e+00 : f32
    %77 = vector.broadcast %cst_29 : f32 to vector<32x128xf32>
    %cst_30 = arith.constant 0.000000e+00 : f32
    %78 = vector.broadcast %cst_30 : f32 to vector<32x1xf32>
    %c0_i32_31 = arith.constant 0 : i32
    %79 = vector.broadcast %c0_i32_31 : i32 to vector<32x1xi32>
    %80 = arith.cmpi eq, %5, %79 : vector<32x1xi32>
    %81 = arith.extui %80 : vector<32x1xi1> to vector<32x1xi32>
    %82 = arith.sitofp %81 : vector<32x1xi32> to vector<32x1xf32>
    %83 = vector.extract_strided_slice %72 {offsets = [0, 0], sizes = [32, 128], strides = [1, 1]} : vector<32x384xf32> to vector<32x128xf32>
    %84 = vector.broadcast %82 : vector<32x1xf32> to vector<32x128xf32>
    %85 = arith.mulf %84, %83 : vector<32x128xf32>
    %86 = arith.addf %76, %85 : vector<32x128xf32>
    %87 = vector.extract_strided_slice %75 {offsets = [0, 0], sizes = [32, 128], strides = [1, 1]} : vector<32x384xf32> to vector<32x128xf32>
    %88 = vector.broadcast %82 : vector<32x1xf32> to vector<32x128xf32>
    %89 = arith.mulf %88, %87 : vector<32x128xf32>
    %90 = arith.addf %77, %89 : vector<32x128xf32>
    %c0_32 = arith.constant 0 : index
    %91 = memref.load %arg12[%c0_32] : memref<3xf32, #tpu.memory_space<smem>>
    %92 = vector.broadcast %91 : f32 to vector<32x1xf32>
    %93 = arith.mulf %82, %92 : vector<32x1xf32>
    %94 = arith.addf %78, %93 : vector<32x1xf32>
    %c1_i32_33 = arith.constant 1 : i32
    %95 = vector.broadcast %c1_i32_33 : i32 to vector<32x1xi32>
    %96 = arith.cmpi eq, %5, %95 : vector<32x1xi32>
    %97 = arith.extui %96 : vector<32x1xi1> to vector<32x1xi32>
    %98 = arith.sitofp %97 : vector<32x1xi32> to vector<32x1xf32>
    %99 = vector.extract_strided_slice %72 {offsets = [0, 128], sizes = [32, 128], strides = [1, 1]} : vector<32x384xf32> to vector<32x128xf32>
    %100 = vector.broadcast %98 : vector<32x1xf32> to vector<32x128xf32>
    %101 = arith.mulf %100, %99 : vector<32x128xf32>
    %102 = arith.addf %86, %101 : vector<32x128xf32>
    %103 = vector.extract_strided_slice %75 {offsets = [0, 128], sizes = [32, 128], strides = [1, 1]} : vector<32x384xf32> to vector<32x128xf32>
    %104 = vector.broadcast %98 : vector<32x1xf32> to vector<32x128xf32>
    %105 = arith.mulf %104, %103 : vector<32x128xf32>
    %106 = arith.addf %90, %105 : vector<32x128xf32>
    %c1 = arith.constant 1 : index
    %107 = memref.load %arg12[%c1] : memref<3xf32, #tpu.memory_space<smem>>
    %108 = vector.broadcast %107 : f32 to vector<32x1xf32>
    %109 = arith.mulf %98, %108 : vector<32x1xf32>
    %110 = arith.addf %94, %109 : vector<32x1xf32>
    %c2_i32_34 = arith.constant 2 : i32
    %111 = vector.broadcast %c2_i32_34 : i32 to vector<32x1xi32>
    %112 = arith.cmpi eq, %5, %111 : vector<32x1xi32>
    %113 = arith.extui %112 : vector<32x1xi1> to vector<32x1xi32>
    %114 = arith.sitofp %113 : vector<32x1xi32> to vector<32x1xf32>
    %115 = vector.extract_strided_slice %72 {offsets = [0, 256], sizes = [32, 128], strides = [1, 1]} : vector<32x384xf32> to vector<32x128xf32>
    %116 = vector.broadcast %114 : vector<32x1xf32> to vector<32x128xf32>
    %117 = arith.mulf %116, %115 : vector<32x128xf32>
    %118 = arith.addf %102, %117 : vector<32x128xf32>
    %119 = vector.extract_strided_slice %75 {offsets = [0, 256], sizes = [32, 128], strides = [1, 1]} : vector<32x384xf32> to vector<32x128xf32>
    %120 = vector.broadcast %114 : vector<32x1xf32> to vector<32x128xf32>
    %121 = arith.mulf %120, %119 : vector<32x128xf32>
    %122 = arith.addf %106, %121 : vector<32x128xf32>
    %c2 = arith.constant 2 : index
    %123 = memref.load %arg12[%c2] : memref<3xf32, #tpu.memory_space<smem>>
    %124 = vector.broadcast %123 : f32 to vector<32x1xf32>
    %125 = arith.mulf %114, %124 : vector<32x1xf32>
    %126 = arith.addf %110, %125 : vector<32x1xf32>
    %127 = vector.shape_cast %118 : vector<32x128xf32> to vector<8x4x128xf32>
    %128 = vector.shape_cast %122 : vector<32x128xf32> to vector<8x4x128xf32>
    %129 = vector.shape_cast %67 : vector<8x128xf32> to vector<8x1x128xf32>
    %130 = vector.broadcast %129 : vector<8x1x128xf32> to vector<8x4x128xf32>
    %131 = arith.mulf %127, %130 : vector<8x4x128xf32>
    %cst_35 = arith.constant dense<0.000000e+00> : vector<8x4xf32>
    %132 = vector.multi_reduction <add>, %131, %cst_35 [2] : vector<8x4x128xf32> to vector<8x4xf32>
    %133 = vector.shape_cast %126 : vector<32x1xf32> to vector<8x4xf32>
    %134 = arith.mulf %132, %133 : vector<8x4xf32>
    %cst_36 = arith.constant 0.176776692 : f32
    %135 = vector.broadcast %cst_36 : f32 to vector<8x4xf32>
    %136 = arith.mulf %134, %135 : vector<8x4xf32>
    %cst_37 = arith.constant dense<0xFF800000> : vector<8xf32>
    %137 = vector.multi_reduction <maximumf>, %136, %cst_37 [1] : vector<8x4xf32> to vector<8xf32>
    %138 = vector.shape_cast %137 : vector<8xf32> to vector<8x1xf32>
    %139 = vector.broadcast %138 : vector<8x1xf32> to vector<8x4xf32>
    %140 = arith.subf %136, %139 : vector<8x4xf32>
    %141 = math.exp %140 : vector<8x4xf32>
    %cst_38 = arith.constant dense<0.000000e+00> : vector<8xf32>
    %142 = vector.multi_reduction <add>, %141, %cst_38 [1] : vector<8x4xf32> to vector<8xf32>
    %143 = vector.shape_cast %142 : vector<8xf32> to vector<8x1xf32>
    %144 = tpu.reciprocal %143 {approx = true} : vector<8x1xf32> -> vector<8x1xf32>
    %145 = vector.broadcast %144 : vector<8x1xf32> to vector<8x4xf32>
    %146 = arith.mulf %141, %145 : vector<8x4xf32>
    %147 = vector.shape_cast %146 : vector<8x4xf32> to vector<8x4x1xf32>
    %148 = vector.broadcast %147 : vector<8x4x1xf32> to vector<8x4x128xf32>
    %149 = arith.mulf %148, %128 : vector<8x4x128xf32>
    %cst_39 = arith.constant dense<0.000000e+00> : vector<8x128xf32>
    %150 = vector.multi_reduction <add>, %149, %cst_39 [1] : vector<8x4x128xf32> to vector<8x128xf32>
    %151 = arith.truncf %150 : vector<8x128xf32> to vector<8x128xbf16>
    %c0_40 = arith.constant 0 : index
    %c0_41 = arith.constant 0 : index
    %152 = vector.load %arg9[%c0_40, %c0_41] : memref<128x384xbf16, #tpu.memory_space<vmem>>, vector<128x384xbf16>
    %cst_42 = arith.constant dense<0.000000e+00> : vector<8x384xf32>
    %153 = tpu.matmul %151, %152, %cst_42 {dimension_numbers = #tpu.dot_dimension_numbers<[1], [0], [0], [1], [0, 0, 1, 1], [], []>} : vector<8x128xbf16>, vector<128x384xbf16>, vector<8x384xf32> -> vector<8x384xf32>
    %cst_43 = arith.constant 0.000000e+00 : f32
    %154 = vector.broadcast %cst_43 : f32 to vector<8x128xf32>
    %cst_44 = arith.constant 0.000000e+00 : f32
    %155 = vector.broadcast %cst_44 : f32 to vector<8x1xf32>
    %c0_i32_45 = arith.constant 0 : i32
    %156 = vector.broadcast %c0_i32_45 : i32 to vector<8x1xi32>
    %157 = arith.cmpi eq, %3, %156 : vector<8x1xi32>
    %158 = arith.extui %157 : vector<8x1xi1> to vector<8x1xi32>
    %159 = arith.sitofp %158 : vector<8x1xi32> to vector<8x1xf32>
    %160 = vector.extract_strided_slice %153 {offsets = [0, 0], sizes = [8, 128], strides = [1, 1]} : vector<8x384xf32> to vector<8x128xf32>
    %161 = vector.broadcast %159 : vector<8x1xf32> to vector<8x128xf32>
    %162 = arith.mulf %161, %160 : vector<8x128xf32>
    %163 = arith.addf %154, %162 : vector<8x128xf32>
    %c0_46 = arith.constant 0 : index
    %164 = memref.load %arg13[%c0_46] : memref<3xf32, #tpu.memory_space<smem>>
    %165 = vector.broadcast %164 : f32 to vector<8x1xf32>
    %166 = arith.mulf %159, %165 : vector<8x1xf32>
    %167 = arith.addf %155, %166 : vector<8x1xf32>
    %c1_i32_47 = arith.constant 1 : i32
    %168 = vector.broadcast %c1_i32_47 : i32 to vector<8x1xi32>
    %169 = arith.cmpi eq, %3, %168 : vector<8x1xi32>
    %170 = arith.extui %169 : vector<8x1xi1> to vector<8x1xi32>
    %171 = arith.sitofp %170 : vector<8x1xi32> to vector<8x1xf32>
    %172 = vector.extract_strided_slice %153 {offsets = [0, 128], sizes = [8, 128], strides = [1, 1]} : vector<8x384xf32> to vector<8x128xf32>
    %173 = vector.broadcast %171 : vector<8x1xf32> to vector<8x128xf32>
    %174 = arith.mulf %173, %172 : vector<8x128xf32>
    %175 = arith.addf %163, %174 : vector<8x128xf32>
    %c1_48 = arith.constant 1 : index
    %176 = memref.load %arg13[%c1_48] : memref<3xf32, #tpu.memory_space<smem>>
    %177 = vector.broadcast %176 : f32 to vector<8x1xf32>
    %178 = arith.mulf %171, %177 : vector<8x1xf32>
    %179 = arith.addf %167, %178 : vector<8x1xf32>
    %c2_i32_49 = arith.constant 2 : i32
    %180 = vector.broadcast %c2_i32_49 : i32 to vector<8x1xi32>
    %181 = arith.cmpi eq, %3, %180 : vector<8x1xi32>
    %182 = arith.extui %181 : vector<8x1xi1> to vector<8x1xi32>
    %183 = arith.sitofp %182 : vector<8x1xi32> to vector<8x1xf32>
    %184 = vector.extract_strided_slice %153 {offsets = [0, 256], sizes = [8, 128], strides = [1, 1]} : vector<8x384xf32> to vector<8x128xf32>
    %185 = vector.broadcast %183 : vector<8x1xf32> to vector<8x128xf32>
    %186 = arith.mulf %185, %184 : vector<8x128xf32>
    %187 = arith.addf %175, %186 : vector<8x128xf32>
    %c2_50 = arith.constant 2 : index
    %188 = memref.load %arg13[%c2_50] : memref<3xf32, #tpu.memory_space<smem>>
    %189 = vector.broadcast %188 : f32 to vector<8x1xf32>
    %190 = arith.mulf %183, %189 : vector<8x1xf32>
    %191 = arith.addf %179, %190 : vector<8x1xf32>
    %192 = vector.broadcast %191 : vector<8x1xf32> to vector<8x128xf32>
    %193 = arith.mulf %187, %192 : vector<8x128xf32>
    %c0_51 = arith.constant 0 : index
    %c0_52 = arith.constant 0 : index
    %194 = vector.load %arg14[%c0_51, %c0_52] : memref<8x128xf32, #tpu.memory_space<vmem>>, vector<8x128xf32>
    tpu.vector_store %arg14[%c0_51, %c0_52], %193 {strides = array<i32>} : memref<8x128xf32, #tpu.memory_space<vmem>>, vector<8x128xf32>,
    return
  }
  func.func @transform_0(%arg0: i32) -> (i32, i32) {
    %c0_i32 = arith.constant 0 : i32
    %c0_i32_0 = arith.constant 0 : i32
    %c0_i32_1 = arith.constant 0 : i32
    return %c0_i32, %c0_i32_0 : i32, i32
  }
  func.func @transform_1(%arg0: i32) -> (i32, i32) {
    %c0_i32 = arith.constant 0 : i32
    %c0_i32_0 = arith.constant 0 : i32
    return %arg0, %c0_i32 : i32, i32
  }
  func.func @transform_2(%arg0: i32) -> (i32, i32) {
    %c0_i32 = arith.constant 0 : i32
    %c0_i32_0 = arith.constant 0 : i32
    return %arg0, %c0_i32 : i32, i32
  }
  func.func @transform_3(%arg0: i32) -> (i32, i32) {
    %c0_i32 = arith.constant 0 : i32
    %c0_i32_0 = arith.constant 0 : i32
    return %arg0, %c0_i32 : i32, i32
  }
  func.func @transform_4(%arg0: i32) -> (i32, i32) {
    %c0_i32 = arith.constant 0 : i32
    %c0_i32_0 = arith.constant 0 : i32
    return %arg0, %c0_i32 : i32, i32
  }
  func.func @transform_5(%arg0: i32) -> (i32, i32) {
    %c0_i32 = arith.constant 0 : i32
    %c0_i32_0 = arith.constant 0 : i32
    return %arg0, %c0_i32 : i32, i32
  }
  func.func @transform_6(%arg0: i32) -> (i32, i32) {
    %c0_i32 = arith.constant 0 : i32
    %c0_i32_0 = arith.constant 0 : i32
    %c0_i32_1 = arith.constant 0 : i32
    return %c0_i32, %c0_i32_0 : i32, i32
  }
  func.func @transform_7(%arg0: i32) -> (i32, i32) {
    %c0_i32 = arith.constant 0 : i32
    %c0_i32_0 = arith.constant 0 : i32
    %c0_i32_1 = arith.constant 0 : i32
    return %c0_i32, %c0_i32_0 : i32, i32
  }
  func.func @transform_8(%arg0: i32) -> (i32, i32) {
    %c0_i32 = arith.constant 0 : i32
    %c0_i32_0 = arith.constant 0 : i32
    %c0_i32_1 = arith.constant 0 : i32
    return %c0_i32, %c0_i32_0 : i32, i32
  }
  func.func @transform_9(%arg0: i32) -> (i32, i32) {
    %c0_i32 = arith.constant 0 : i32
    %c0_i32_0 = arith.constant 0 : i32
    %c0_i32_1 = arith.constant 0 : i32
    return %c0_i32, %c0_i32_0 : i32, i32
  }
  func.func @transform_10(%arg0: i32) -> (i32, i32) {
    %c0_i32 = arith.constant 0 : i32
    %c0_i32_0 = arith.constant 0 : i32
    %c0_i32_1 = arith.constant 0 : i32
    return %c0_i32, %c0_i32_0 : i32, i32
  }
  func.func @transform_11(%arg0: i32) -> i32 {
    %c0_i32 = arith.constant 0 : i32
    %c0_i32_0 = arith.constant 0 : i32
    return %c0_i32 : i32
  }
  func.func @transform_12(%arg0: i32) -> i32 {
    %c0_i32 = arith.constant 0 : i32
    %c0_i32_0 = arith.constant 0 : i32
    return %c0_i32 : i32
  }
  func.func @transform_13(%arg0: i32) -> (i32, i32) {
    %c0_i32 = arith.constant 0 : i32
    %c0_i32_0 = arith.constant 0 : i32
    return %arg0, %c0_i32 : i32, i32
  }
}

</mosaic_0001>

<bundles_post_ra>
// kernel: tpu_custom_call.1
= control target key start
LH: loop header
LB: loop body
LE: loop exit
PB: predicated region body
PF: predicated region fallthrough
CT: control target
= control target key end

     0   :  { %s4838_s0 = inlined_call_operand.hbm [shape: bf16[16,32], index: 0, kind: input, shape index: {}]   ;;  %s4839_s1 = inlined_call_operand.hbm [shape: bf16[16,32], index: 1, kind: input, shape index: {}]   ;;  %s4840_s2 = inlined_call_operand.vmem [shape: s32[64,1], index: 2, kind: input, shape index: {}]   ;;  %s4841_s3 = inlined_call_operand.vmem [shape: s32[16,1], index: 3, kind: input, shape index: {}]   ;;  %s4842_s4 = inlined_call_operand.vmem [shape: s32[64,1], index: 4, kind: input, shape index: {}]   ;;  %s4843_s5 = inlined_call_operand.vmem [shape: s32[64,1], index: 5, kind: input, shape index: {}]   ;;  %s4844_s6 = inlined_call_operand.hbm [shape: bf16[32,768], index: 6, kind: input, shape index: {}]   ;;  %s4845_s7 = inlined_call_operand.vmem [shape: bf16[32,384], index: 7, kind: input, shape index: {}]   ;;  %s4846_s8 = inlined_call_operand.vmem [shape: bf16[128,384], index: 8, kind: input, shape index: {}]   ;;  %s4847_s9 = inlined_call_operand.hbm [shape: bf16[128,384], index: 9, kind: input, shape index: {}]   ;;  %s4848_s10 = inlined_call_operand.hbm [shape: bf16[128,384], index: 10, kind: input, shape index: {}]   ;;  %s4849_s11 = inlined_call_operand.vmem [shape: f32[3], index: 11, kind: input, shape index: {}]   ;;  %s4850_s12 = inlined_call_operand.vmem [shape: f32[3], index: 12, kind: input, shape index: {}]   ;;  %s4851_s13 = inlined_call_operand.hbm [shape: f32[16,128], index: 13, kind: output, shape index: {}]  }
   0x1   :  { %4869 = sst [smem:[#allocation23_spill]] %s4838_s0 }
   0x2   :  { %4870 = sst [smem:[#allocation24_spill]] %s4839_s1 }
   0x3   :  { %4871 = sst [smem:[#allocation25_spill]] %s4842_s4 }
   0x4   :  { %4872 = sst [smem:[#allocation26_spill]] %s4843_s5 }
   0x5   :  { %4873 = sst [smem:[#allocation27_spill]] %s4844_s6 }
   0x6   :  { %4874 = sst [smem:[#allocation28_spill]] %s4845_s7 }
   0x7   :  { %4875 = sst [smem:[#allocation29_spill]] %s4846_s8 }
   0x8   :  { %4876 = sst [smem:[#allocation30_spill]] %s4851_s13 }
   0x9   :  { %18 = vsyncpa [#allocation3], 0 }
   0xa   :  { %19 = vsyncpa [#allocation7], 0 }
   0xb   :  { %21 = vsyncpa [#allocation7 + $0x1], 0 }
   0xc   :  { %22 = vsyncpa [#allocation10], 0 }
   0xd   :  { %23 = vsyncpa [#allocation5], 0 }
   0xe   :  { %24 = vsyncpa [#allocation14], 0 }
   0xf   :  { %25 = vsyncpa [#allocation4], 0 }
  0x10   :  { %27 = vsyncpa [#allocation4 + $0x1], 0  ;;  %s3965_s25 = smov 0   ;;  %s3967_s26 = smov 0  }
  0x11   :  { %s3969_s27 = smov 0   ;;  %s3971_s28 = smov 0  }
  0x12 LB: > { %s3877_s29 = smov [#allocation8]   ;;  %s3986_s14 = sadd.s32 4294967295, %s3875_s28   ;;  %s3875_s28 = sphi %s3971_s28, %s4921_s28   ;;  %s3871_s27 = sphi %s3969_s27, %s4920_s27   ;;  %s3867_s26 = sphi %s3967_s26, %s4919_s26   ;;  %s3863_s25 = sphi %s3965_s25, %s4918_s25  }
  0x13   : > { %s387_s30 = sshll.u32 %s3877_s29, 4  ;;  %p3017_p0 = scmp.ge.s32.totalorder %s3875_s28, 1  ;;  %s3991_s30 = int_to_ptr.vmem [resolvable:$true] %s387_s30 }
  0x14   : > { %p4855_p1 = scmp.eq.s32.totalorder %s3986_s14, 0  ;;  %p362_p2 = scmp.lt.s32.totalorder %s3875_s28, 3 }
  0x15   : > { %s3878_s16 = smov [#allocation9]   ;;  %s3879_s19 = smov [#allocation2]  }
  0x16   : > { %p3993_p3 = pnand %p3017_p0, %p362_p2  ;;  %s406_s17 = sshll.u32 %s3878_s16, 4  ;;  %s4006_s17 = int_to_ptr.vmem [resolvable:$true] %s406_s17 }
  0x17   : > { %s4008_s20 = sshll.u32 %s3879_s19, 4  ;;  %s4879_s6 = sld [smem:[#allocation27_spill]]  ;;  %s375_s20 = int_to_ptr.vmem [resolvable:$true] %s4008_s20 }
  0x18   : > { %s4877_s15 = scalar_select %p3993_p3, 1, 0 }
  0x19   : > { %p3320_p5 = pneg %p3993_p3 }
  0x1b   : > { %p4002_p6 = pnand %p3320_p5, %p4855_p1 }
  0x1d   : > { %s3617_s23 = scalar_lea.hbm %s4879_s6, 1536  ;;  %p4018_p8 = pneg %p4002_p6 }
  0x1e   : > { %p3618_p7 = scmp.ne.s32.totalorder %s4879_s6, %s3617_s23  ;;  %p3624_p11 = scmp.lt.u32.totalorder %s3617_s23, %s4879_s6 }
  0x20   : > { %p3620_p9 = pnand %p4018_p8, %p3618_p7 }
  0x22   : > { %p3621_p10 = pneg %p3620_p9 }
  0x24   : > { %p3626_p12 = pnand %p3624_p11, %p3621_p10 }
  0x26   : > { %3629 = shalt.err (!%p3626_p12)
}
  0x27   : > { %s3630_s21 = scalar_lea.vmem %s3991_s30, 1536  ;;  %p3638_p5 = scmp.lt.s32.totalorder %s3991_s30, %s3991_s30 }
  0x28   : > { %p3631_p13 = scmp.ne.s32.totalorder %s3991_s30, %s3630_s21  ;;  %p3639_p4 = scmp.lt.s32.totalorder %s3630_s21, %s3630_s21 }
  0x2a   : > { %p3633_p0 = pnand %p3631_p13, %p4018_p8  ;;  %p3640_p7 = por %p3639_p4, %p3638_p5 }
  0x2c   : > { %p3634_p2 = pneg %p3633_p0 }
  0x2e   : > { %p3641_p9 = pnand %p3640_p7, %p3634_p2 }
  0x30   : > { %3644 = shalt.err (!%p3641_p9)
}
  0x31   : > { %s3880_s22 = smov 384   ;;  %s3881_s13 = smov 24  }
  0x32   : > { %3326 = dma.hbm_to_vmem [thread:$0]  (!%p4002_p6), %s4879_s6, 1536, %s3991_s30, [#allocation7], %s3880_s22, %s3880_s22, %s3881_s13  }
  0x33   : > { %s3645_s8 = scalar_lea.hbm %s4847_s9, 3072 }
  0x34   : > { %p3646_p4 = scmp.ne.s32.totalorder %s4847_s9, %s3645_s8  ;;  %p3652_p12 = scmp.lt.u32.totalorder %s3645_s8, %s4847_s9 }
  0x36   : > { %p3648_p10 = pnand %p3646_p4, %p4018_p8 }
  0x38   : > { %p3649_p11 = pneg %p3648_p10 }
  0x3a   : > { %p3654_p13 = pnand %p3652_p12, %p3649_p11 }
  0x3c   : > { %3657 = shalt.err (!%p3654_p13)
}
  0x3d   : > { %s3658_s30 = scalar_lea.vmem %s4006_s17, 3072  ;;  %p3666_p7 = scmp.lt.s32.totalorder %s4006_s17, %s4006_s17 }
  0x3e   : > { %p3659_p0 = scmp.ne.s32.totalorder %s4006_s17, %s3658_s30  ;;  %p3667_p9 = scmp.lt.s32.totalorder %s3658_s30, %s3658_s30 }
  0x40   : > { %p3661_p2 = pnand %p3659_p0, %p4018_p8  ;;  %p3668_p4 = por %p3667_p9, %p3666_p7 }
  0x42   : > { %p3662_p5 = pneg %p3661_p2 }
  0x44   : > { %p3669_p10 = pnand %p3668_p4, %p3662_p5 }
  0x46   : > { %3672 = shalt.err (!%p3669_p10)
}
  0x47   : > { %s4857_s5 = smov 192   ;;  %s4858_s4 = smov 12  }
  0x48   : > { %3329 = dma.hbm_to_vmem [thread:$0]  (!%p4002_p6), %s4847_s9, 3072, %s4006_s17, [#allocation10], %s4857_s5, %s4857_s5, %s4858_s4  }
  0x49   : > { %s4881_s0 = sld [smem:[#allocation23_spill]] }
  0x4f   : > { %s3673_s23 = scalar_lea.hbm %s4881_s0, 128 }
  0x50   : > { %p3674_p11 = scmp.ne.s32.totalorder %s4881_s0, %s3673_s23  ;;  %p3680_p0 = scmp.lt.u32.totalorder %s3673_s23, %s4881_s0 }
  0x52   : > { %p3676_p12 = pnand %p3674_p11, %p4018_p8 }
  0x54   : > { %p3677_p13 = pneg %p3676_p12 }
  0x56   : > { %p3682_p2 = pnand %p3680_p0, %p3677_p13 }
  0x58   : > { %3685 = shalt.err (!%p3682_p2)
}
  0x59   : > { %s3686_s30 = scalar_lea.vmem %s375_s20, 128  ;;  %p3694_p4 = scmp.lt.s32.totalorder %s375_s20, %s375_s20 }
  0x5a   : > { %p3687_p5 = scmp.ne.s32.totalorder %s375_s20, %s3686_s30  ;;  %p3695_p10 = scmp.lt.s32.totalorder %s3686_s30, %s3686_s30 }
  0x5c   : > { %p3689_p7 = pnand %p3687_p5, %p4018_p8  ;;  %p3696_p1 = por %p3695_p10, %p3694_p4 }
  0x5e   : > { %p3690_p9 = pneg %p3689_p7 }
  0x60   : > { %p3697_p3 = pnand %p3696_p1, %p3690_p9 }
  0x62   : > { %3700 = shalt.err (!%p3697_p3)
}
  0x63   : > { %s3884_s17 = smov 64   ;;  %s3885_s7 = smov 4  }
  0x64   : > { %3323 = dma.hbm_to_vmem [thread:$0]  (!%p4002_p6), %s4881_s0, 128, %s375_s20, [#allocation3], %s3884_s17, %s3884_s17, %s3885_s7  }
  0x65   : > { %s3886_s13 = smov [#allocation11]   ;;  %s433_s19 = sshll.u32 %s4849_s11, 4  ;;  %s4087_s19 = int_to_ptr.vmem [resolvable:$true] %s433_s19 }
  0x66   : > { %s419_s23 = sshll.u32 %s3886_s13, 4  ;;  %s3701_s5 = scalar_lea.hbm %s4848_s10, 3072  ;;  %s420_s23 = int_to_ptr.vmem [resolvable:$true] %s419_s23 }
  0x67   : > { %p3702_p1 = scmp.ne.s32.totalorder %s4848_s10, %s3701_s5  ;;  %p3708_p12 = scmp.lt.u32.totalorder %s3701_s5, %s4848_s10 }
  0x69   : > { %p3704_p3 = pnand %p3702_p1, %p4018_p8 }
  0x6b   : > { %p3705_p11 = pneg %p3704_p3 }
  0x6d   : > { %p3710_p13 = pnand %p3708_p12, %p3705_p11 }
  0x6f   : > { %3713 = shalt.err (!%p3710_p13)
}
  0x70   : > { %s3714_s7 = scalar_lea.vmem %s420_s23, 3072  ;;  %p3722_p7 = scmp.lt.s32.totalorder %s420_s23, %s420_s23 }
  0x71   : > { %p3715_p0 = scmp.ne.s32.totalorder %s420_s23, %s3714_s7  ;;  %p3723_p9 = scmp.lt.s32.totalorder %s3714_s7, %s3714_s7 }
  0x73   : > { %p3717_p2 = pnand %p3715_p0, %p4018_p8  ;;  %p3724_p4 = por %p3723_p9, %p3722_p7 }
  0x75   : > { %p3718_p5 = pneg %p3717_p2 }
  0x77   : > { %p3725_p10 = pnand %p3724_p4, %p3718_p5 }
  0x79   : > { %3728 = shalt.err (!%p3725_p10)
}
  0x7a   : > { %s4882_s6 = smov 12   ;;  %s4883_s4 = smov 192  }
  0x7b   : > { %3332 = dma.hbm_to_vmem [thread:$0]  (!%p4002_p6), %s4848_s10, 3072, %s420_s23, [#allocation10], %s4883_s4, %s4883_s4, %s4882_s6  }
  0x7c   : > { %s444_s24 = sshll.u32 %s4850_s12, 4  ;;  %s3729_s29 = scalar_lea.vmem %s4087_s19, 16  ;;  %s445_s24 = int_to_ptr.vmem [resolvable:$true] %s444_s24 }
  0x7d   : > { %p3730_p1 = scmp.ne.s32.totalorder %s4087_s19, %s3729_s29  ;;  %p3737_p12 = scmp.lt.s32.totalorder %s4087_s19, %s4087_s19 }
  0x7e   : > { %p3738_p13 = scmp.lt.s32.totalorder %s3729_s29, %s3729_s29 }
  0x7f   : > { %p3732_p3 = pnand %p3730_p1, %p4018_p8 }
  0x80   : > { %p3739_p0 = por %p3738_p13, %p3737_p12 }
  0x81   : > { %p3733_p11 = pneg %p3732_p3 }
  0x83   : > { %p3740_p2 = pnand %p3739_p0, %p3733_p11 }
  0x85   : > { %3743 = shalt.err (!%p3740_p2)
}
  0x86   : > { %s3887_s21 = smov [#allocation12]   ;;  %s3744_s23 = scalar_lea.vmem %s445_s24, 16 }
  0x87   : > { %3335 = dma.vmem_to_smem (!%p4002_p6), %s4087_s19, 16, %s3887_s21, [#allocation5]  }
  0x88   : > { %p3745_p5 = scmp.ne.s32.totalorder %s445_s24, %s3744_s23  ;;  %p3752_p4 = scmp.lt.s32.totalorder %s445_s24, %s445_s24 }
  0x89   : > { %p3753_p10 = scmp.lt.s32.totalorder %s3744_s23, %s3744_s23 }
  0x8a   : > { %p3747_p7 = pnand %p3745_p5, %p4018_p8 }
  0x8b   : > { %p3754_p1 = por %p3753_p10, %p3752_p4 }
  0x8c   : > { %p3748_p9 = pneg %p3747_p7 }
  0x8e   : > { %p3755_p3 = pnand %p3754_p1, %p3748_p9 }
  0x90   : > { %3758 = shalt.err (!%p3755_p3)
}
  0x91   : > { %s3888_s30 = smov [#allocation13]   ;;  %s3016_s16 = sadd.s32 4294967294, %s3875_s28  }
  0x92   : > { %3338 = dma.vmem_to_smem (!%p4002_p6), %s445_s24, 16, %s3888_s30, [#allocation14]  }
  0x93   : > { %s4128_s19 = sadd.s32 1, %s3875_s28   ;;  %s61_s20 = sadd.s32 1, %s3871_s27 }
  0x94   : > { %s58_s18 = ssub.s32 %s3875_s28, %s4128_s19  ;;  %p68_p11 = scmp.ne.s32.totalorder %s3871_s27, %s3867_s26 }
  0x95   : > { %p59_p8 = scmp.eq.s32.totalorder %s58_s18, 0  ;;  %p69_p12 = scmp.eq.s32.totalorder %s3875_s28, 0 }
  0x96   : > { %p74_p13 = scmp.ne.s32.totalorder %s3867_s26, %s3863_s25  ;;  %p4885_p2 = scmp.eq.s32.totalorder %s3986_s14, 0 }
  0x97   : > { %s4139_s17 = scalar_select %p59_p8, %s3871_s27, %s61_s20  }
  0x98   : > { %p4141_p0 = por %p69_p12, %p68_p11  ;;  %p4147_p6 = por %p4885_p2, %p74_p13 }
  0x99   : > { %p349_p5 = scmp.eq.s32.totalorder %s3986_s14, 1  ;;  %p355_p7 = scmp.eq.s32.totalorder %s3016_s16, 1 }
  0x9a   : > { %p3353_p9 = scmp.lt.s32.totalorder %s3875_s28, 2  ;;  %s455_s4 = sand.u32 1, %s3875_s28  }
  0x9b   : > { %p4154_p4 = por %p349_p5, %p68_p11  ;;  %p4158_p10 = por %p355_p7, %p74_p13 }
  0x9c   : > { %s457_s22 = sand.u32 1, %s3871_s27   ;;  %s3026_s24 = sshll.u32 %s3875_s28, 6 }
  0x9d   : > { %s4887_s8 = scalar_select %p4154_p4, 1, 0 }
  0x9e   : > { %s4888_s5 = scalar_select %p4158_p10, 1, 0 }
  0x9f   : > { %s3025_s13 = sshll.u32 %s457_s22, 2  ;;  %s4889_s1 = sld [smem:[#allocation24_spill]] }
  0xa0   : > { %s459_s30 = scalar_lea.vmem [#allocation6], %s3025_s13  ;;  %p4171_p1 = pnand %p3353_p9, %p4141_p0 }
  0xa1   : > { %s466_s16 = sshll.u32 %s459_s30, 4  ;;  %s456_s20 = scalar_lea.sflag [#allocation7], %s455_s4  ;;  %s4175_s16 = int_to_ptr.vmem [resolvable:$true] %s466_s16 }
  0xa2   : > { %p3761_p8 = pneg %p4171_p1 }
  0xa5   : > { %s4167_s23 = scalar_lea.hbm %s4889_s1, %s3026_s24  ;;  %s3764_s7 = scalar_lea.hbm %s4889_s1, 128 }
  0xa6   : > { %s3759_s22 = scalar_lea.hbm %s4167_s23, 64  ;;  %p3765_p13 = scmp.lt.u32.totalorder %s4167_s23, %s4889_s1 }
  0xa7   : > { %p3760_p3 = scmp.ne.s32.totalorder %s4167_s23, %s3759_s22  ;;  %p3766_p0 = scmp.lt.u32.totalorder %s3764_s7, %s3759_s22 }
  0xa8   : > { %p3768_p5 = scmp.lt.u32.totalorder %s3759_s22, %s4167_s23 }
  0xa9   : > { %p3762_p11 = pnand %p3761_p8, %p3760_p3  ;;  %p3767_p2 = por %p3766_p0, %p3765_p13 }
  0xab   : > { %p3763_p12 = pneg %p3762_p11  ;;  %p3769_p7 = por %p3768_p5, %p3767_p2 }
  0xad   : > { %p3770_p9 = pnand %p3769_p7, %p3763_p12 }
  0xaf   : > { %3773 = shalt.err (!%p3770_p9)
}
  0xb0   : > { %s3774_s4 = scalar_lea.vmem %s4175_s16, 64  ;;  %s3889_s30 = smov [#allocation6]  }
  0xb1   : > { %p3775_p3 = scmp.ne.s32.totalorder %s4175_s16, %s3774_s4  ;;  %s3779_s13 = sshll.u32 %s3889_s30, 4  ;;  %s3780_s13 = int_to_ptr.vmem [resolvable:$false] %s3779_s13 }
  0xb2   : > { %s3781_s24 = scalar_lea.vmem %s3780_s13, 128  ;;  %p3782_p4 = scmp.lt.s32.totalorder %s4175_s16, %s3780_s13 }
  0xb3   : > { %p3777_p11 = pnand %p3775_p3, %p3761_p8  ;;  %p3783_p13 = scmp.lt.s32.totalorder %s3781_s24, %s3774_s4 }
  0xb5   : > { %p3778_p10 = pneg %p3777_p11  ;;  %p3784_p0 = por %p3783_p13, %p3782_p4 }
  0xb7   : > { %p3785_p2 = pnand %p3784_p0, %p3778_p10 }
  0xb9   : > { %3788 = shalt.err (!%p3785_p2)
}
  0xba   : > { %3342 = dma.hbm_to_vmem [thread:$0]  (!%p4171_p1), %s4167_s23, 64, %s4175_s16, %s456_s20  }
  0xbb   : > { %p4891_p12 = scmp.ne.s32.totalorder %s4877_s15, 0 }
  0xbc   : > { %p4892_p8 = scmp.eq.s32.totalorder (!%p4891_p12), %s3986_s14, 0 }
  0xbd   : > { %509 = sbr.rel (%p4891_p12) target bundleno = 2221 (0x8ad), region = 72 }
  0xc4   : > { %3834 = dma.done.wait (%p4892_p8), [#allocation3], 128   ;;  %p4893_p5 = pmov %p4892_p8 }
  0xc5   : > { %s515_s22 = sand.u32 1, %s3986_s14   ;;  %s4210_s7 = sand.u32 1, %s3867_s26  }
  0xc6   : > { %3836 = vsyncadd (%p4893_p5), [#allocation3], 4294967168  ;;  %s3029_s18 = sshll.u32 %s4210_s7, 2  ;;  %s516_s29 = scalar_lea.sflag [#allocation7], %s515_s22 }
  0xc7   : > { %s4213_s21 = scalar_lea.vmem [#allocation6], %s3029_s18 }
  0xc8   : > { %3838 = dma.done.wait (%p4147_p6), %s516_s29, 64  }
  0xc9   : > { %3840 = vsyncadd (%p4147_p6), %s516_s29, 4294967232  ;;  %p4894_p4 = pmov %p4893_p5 }
  0xcb   : > { %3842 = dma.done.wait (%p4894_p4), [#allocation7], 1536   ;;  %p4895_p10 = pmov %p4894_p4 }
  0xcc   : > { %p4896_p1 = pmov %p4894_p4 }
  0xcd   : > { %3844 = vsyncadd (%p4895_p10), [#allocation7], 4294965760 }
  0xce   : > { %3846 = dma.done.wait (%p4896_p1), [#allocation10], 6144   ;;  %p4897_p7 = pmov %p4896_p1 }
  0xcf   : > { %p4898_p9 = pmov %p4896_p1 }
  0xd0   : > { %3848 = vsyncadd (%p4897_p7), [#allocation10], 4294961152 }
  0xd1   : > { %3850 = dma.done.wait (%p4898_p9), [#allocation5], 16   ;;  %p4899_p3 = pmov %p4896_p1 }
  0xd2   : > { %p4900_p6 = pmov %p4896_p1 }
  0xd3   : > { %3852 = vsyncadd (%p4899_p3), [#allocation5], 4294967280 }
  0xd4   : > { %3854 = dma.done.wait (%p4900_p6), [#allocation14], 16   ;;  %p4901_p11 = pmov %p4896_p1 }
  0xd6   : > { %3856 = vsyncadd (%p4901_p11), [#allocation14], 4294967280 }
  0xd7   : > { %544 = sfence }
  0xd8   : > { %s3036_s15 = sshll.u32 %s3986_s14, 2  ;;  %p608_p13 = scmp.lt.s32.totalorder %s3986_s14, 1  ;;  %v3890_v0 = vmov 0   ;;  %v4863_v10 = vmov 0.0   ;;  %v3476_v21 = vld [vmem:[#allocation2] sm:$0xff]   ;;  %v641_v59 = vlaneseq }
  0xd9   : > { %3410 = vset.pattern.permute.xlu1 %v3890_v0  ;;  %3409 = vset.pattern.permute.xlu0 %v3890_v0  ;;  %p603_p0 = scmp.lt.s32.totalorder %s3036_s15, 7  ;;  %s4902_s0 = sld [smem:[#allocation25_spill]]  ;;  %v3479_v56 = vld [vmem:[#allocation8 + $0x4] ss:$24 sps:$4 sm:$0xff]   ;;  %v3482_v58 = vld [vmem:[#allocation8 + $0x8] ss:$24 sps:$4 sm:$0xff]  }
  0xda   : > { %s609_s6 = scalar_select %p608_p13, %s3986_s14, 1  ;;  %897 = vmatprep.mubr.bf16.mxu0 %v3890_v0  ;;  %3218 = vmatprep.subr.bf16.mxu1 %v3476_v21  ;;  %v3480_v57 = vld [vmem:[#allocation8 + $0xc] ss:$24 sps:$4 sm:$0xff]   ;;  %v4333_v60 = vand.u32 127, %v641_v59 }
  0xdb   : > { %s4923_s15 = smov (!%p603_p0, %s3036_s15), 7  ;;  %3219 = vmatpush3.bf16.msra.mxu1 %v3476_v21  ;;  %865 = vmatprep.subr.bf16.mxu0 %v3480_v57  ;;  %s4904_s20 = sld [smem:[#allocation28_spill]]  ;;  %v3489_v21 = vld [vmem:[#allocation8 + $0x10] ss:$24 sps:$4 sm:$0xff]   ;;  %v3520_v57 = vld [vmem:[#allocation9 + $0x38] ss:$12 sps:$4 sm:$0xff]  }
  0xdc   : > { %s3038_s23 = sshll.u32 %s609_s6, 3  ;;  %s3037_s16 = sshll.u32 %s4923_s15, 3  ;;  %812 = vmatprep.subr.bf16.mxu1 %v3479_v56  ;;  %866 = vmatpush1.bf16.msra.mxu0 %v3482_v58  ;;  %v3519_v56 = vld [vmem:[#allocation9 + $0x64] ss:$12 sps:$4 sm:$0xff]   ;;  %v3517_v58 = vld [vmem:[#allocation9 + $0x60] ss:$12 sps:$4 sm:$0xff]  }
  0xdd   : > { %s611_s30 = scalar_lea.vmem %s4841_s3, %s3038_s23  ;;  %s606_s22 = scalar_lea.vmem %s4840_s2, %s3037_s16 }
  0xde   : > { %v632_v1 = vld [vmem:[%s611_s30] sm:$0xff]  ;;  %v630_v2 = vld [vmem:[%s606_s22 + $0x10] sm:$0xff]  ;;  %v631_v4 = vld [vmem:[%s606_s22 + $0x18] sm:$0xff]  ;;  %s4903_s6 = sld [smem:[#allocation26_spill]]  ;;  %s3177_s4 = sld [smem:[#allocation13 + $0x1]] }
  0xdf   : > { %s616_s1 = scalar_lea.vmem %s4902_s0, %s3037_s16  ;;  %v628_v3 = vld [vmem:[%s606_s22] sm:$0xff]  ;;  %650 = vperm.xlu1 %3410, %v630_v2   ;;  %v629_v5 = vld [vmem:[%s606_s22 + $0x8] sm:$0xff]  ;;  %vm1223_vm6 = vcmp.eq.s32.totalorder %v632_v1, 2  ;;  %vm1107_vm13 = vcmp.eq.s32.totalorder %v632_v1, 0  ;;  %vm1165_vm14 = vcmp.eq.s32.totalorder %v632_v1, 1  ;;  %s3178_s30 = sld [smem:[#allocation13 + $0x2]] }
  0xe0   : > { %644 = vperm.xlu0 %3409, %v628_v3   ;;  %v633_v6 = vld [vmem:[%s616_s1] sm:$0xff]  ;;  %v634_v7 = vld [vmem:[%s616_s1 + $0x8] sm:$0xff]  ;;  %v635_v8 = vld [vmem:[%s616_s1 + $0x10] sm:$0xff]  ;;  %v4271_v30 = vsel %vm1223_vm6, 1.0, %v4863_v10  ;;  %v4274_v31 = vsel %vm1107_vm13, 1.0, %v4863_v10  ;;  %v4277_v32 = vsel %vm1165_vm14, 1.0, %v4863_v10 }
  0xe1   : > { %vm1153_vm0 = vcmp.eq.s32.totalorder %v633_v6, 1  ;;  %vm1154_vm1 = vcmp.eq.s32.totalorder %v634_v7, 1  ;;  %vm1095_vm2 = vcmp.eq.s32.totalorder %v633_v6, 0  ;;  %vm1096_vm3 = vcmp.eq.s32.totalorder %v634_v7, 0  ;;  %v636_v9 = vld [vmem:[%s616_s1 + $0x18] sm:$0xff]  ;;  %s3152_s1 = sld [smem:[#allocation12 + $0x2]] }
  0xe2   : > { %v3081_v11 = vsel %vm1153_vm0, 1.0, %v4863_v10  ;;  %v3082_v12 = vsel %vm1154_vm1, 1.0, %v4863_v10  ;;  %v3076_v13 = vsel %vm1095_vm2, 1.0, %v4863_v10  ;;  %v3077_v14 = vsel %vm1096_vm3, 1.0, %v4863_v10  ;;  %s4909_s22 = sld [smem:[#allocation29_spill]]  ;;  %s4914_s18 = sld [smem:[#allocation30_spill]] }
  0xe3   : > { %v3416_v15 = vpack.i.bf16 %v3082_v12, %v3081_v11  ;;  %vm1097_vm4 = vcmp.eq.s32.totalorder %v635_v8, 0  ;;  %vm1098_vm5 = vcmp.eq.s32.totalorder %v636_v9, 0  ;;  %653 = vperm.xlu1 %3410, %v631_v4   ;;  %v3411_v16 = vpack.i.bf16 %v3077_v14, %v3076_v13  ;;  %v3486_v11 = vld [vmem:[#allocation8 + $0x3c] ss:$24 sps:$4 sm:$0xff]   ;;  %v3483_v12 = vld [vmem:[#allocation8 + $0x30] ss:$24 sps:$4 sm:$0xff]  }
  0xe4   : > { %s4257_s23 = scalar_lea.vmem %s4903_s6, %s3037_s16  ;;  %647 = vperm.xlu0 %3409, %v629_v5   ;;  %v3078_v17 = vsel %vm1097_vm4, 1.0, %v4863_v10  ;;  %vm1211_vm7 = vcmp.eq.s32.totalorder %v633_v6, 2  ;;  %vm1212_vm8 = vcmp.eq.s32.totalorder %v634_v7, 2  ;;  %v3079_v18 = vsel %vm1098_vm5, 1.0, %v4863_v10  ;;  %v3488_v13 = vld [vmem:[#allocation8 + $0x38] ss:$24 sps:$4 sm:$0xff]   ;;  %867 = vmatprep.subr.bf16.mxu0 %v3486_v11 }
  0xe5   : > { %v3086_v19 = vsel %vm1211_vm7, 1.0, %v4863_v10  ;;  %v3087_v20 = vsel %vm1212_vm8, 1.0, %v4863_v10  ;;  %vm1213_vm9 = vcmp.eq.s32.totalorder %v635_v8, 2  ;;  %vm1214_vm10 = vcmp.eq.s32.totalorder %v636_v9, 2  ;;  %v637_v22 = vld [vmem:[%s4257_s23] sm:$0xff]  ;;  %v638_v23 = vld [vmem:[%s4257_s23 + $0x8] sm:$0xff]  ;;  %868 = vmatpush1.bf16.msra.mxu0 %v3488_v13 }
  0xe6   : > { %vm1155_vm11 = vcmp.eq.s32.totalorder %v635_v8, 1  ;;  %vm1156_vm12 = vcmp.eq.s32.totalorder %v636_v9, 1  ;;  %v3426_v24 = vpack.i.bf16 %v3079_v18, %v3078_v17  ;;  %v3421_v25 = vpack.i.bf16 %v3087_v20, %v3086_v19  ;;  %v640_v36 = vld [vmem:[%s4257_s23 + $0x18] sm:$0xff]  ;;  %v639_v37 = vld [vmem:[%s4257_s23 + $0x10] sm:$0xff]  ;;  %s3147_s23 = sld [smem:[#allocation12 + $0x1]]  ;;  %s2799_s16 = sld [smem:[#allocation13]] }
  0xe7   : > { %3417 = vperm.xlu1 %3410, %v3416_v15   ;;  %v3088_v26 = vsel %vm1213_vm9, 1.0, %v4863_v10  ;;  %v3089_v27 = vsel %vm1214_vm10, 1.0, %v4863_v10  ;;  %v3083_v28 = vsel %vm1155_vm11, 1.0, %v4863_v10  ;;  %v3084_v29 = vsel %vm1156_vm12, 1.0, %v4863_v10  ;;  %v3477_v8 = vld [vmem:[#allocation8] ss:$24 sps:$4 sm:$0xff]  }
  0xe8   : > { %3412 = vperm.xlu0 %3409, %v3411_v16   ;;  %vm1797_vm15 = vcmp.eq.s32.totalorder %v637_v22, 0  ;;  %v3436_v33 = vpack.i.bf16 %v3089_v27, %v3088_v26  ;;  %v3431_v34 = vpack.i.bf16 %v3084_v29, %v3083_v28  ;;  %vm1856_vm0 = vcmp.eq.s32.totalorder %v638_v23, 1  ;;  %v3485_v9 = vld [vmem:[#allocation8 + $0x34] ss:$24 sps:$4 sm:$0xff]   ;;  %v3492_v26 = vld [vmem:[#allocation8 + $0x40] ss:$24 sps:$4 sm:$0xff]  }
  0xe9   : > { %v4280_v35 = vsel %vm1797_vm15, 1.0, %v4863_v10  ;;  %vm1913_vm1 = vcmp.eq.s32.totalorder %v637_v22, 2  ;;  %vm1798_vm2 = vcmp.eq.s32.totalorder %v638_v23, 0  ;;  %vm1855_vm3 = vcmp.eq.s32.totalorder %v637_v22, 1  ;;  %v3491_v14 = vld [vmem:[#allocation8 + $0x14] ss:$24 sps:$4 sm:$0xff]  }
  0xea   : > { %v3446_v38 = vpack.i.bf16 %v4280_v35, %v4271_v30  ;;  %v4287_v39 = vsel %vm1856_vm0, 1.0, %v4863_v10  ;;  %vm1800_vm4 = vcmp.eq.s32.totalorder %v640_v36, 0  ;;  %vm1914_vm5 = vcmp.eq.s32.totalorder %v638_v23, 2  ;;  %v3497_v15 = vld [vmem:[%s4904_s20 + $0x4] ss:$12 sps:$4 sm:$0xff]   ;;  %s2823_s0 = scalar_lea.sflag [#allocation4], %s4210_s7 }
  0xeb   : > { %3427 = vperm.xlu1 %3410, %v3426_v24   ;;  %v3441_v40 = vpack.i.bf16 %v4277_v32, %v4274_v31  ;;  %v4292_v41 = vsel %vm1913_vm1, 1.0, %v4863_v10  ;;  %vm1799_vm6 = vcmp.eq.s32.totalorder %v639_v37, 0  ;;  %vm1857_vm7 = vcmp.eq.s32.totalorder %v639_v37, 1  ;;  %1014 = vmatprep.subr.bf16.mxu0 %v3497_v15  ;;  %v3494_v23 = vld [vmem:[#allocation8 + $0x44] ss:$24 sps:$4 sm:$0xff]   ;;  %p4915_p12 = scmp.ne.s32.totalorder %s4887_s8, 0 }
  0xec   : > { %3422 = vperm.xlu0 %3409, %v3421_v25   ;;  %v4295_v42 = vsel %vm1798_vm2, 1.0, %v4863_v10  ;;  %v4298_v43 = vsel %vm1855_vm3, 1.0, %v4863_v10  ;;  %v4301_v44 = vsel %vm1800_vm4, 1.0, %v4863_v10  ;;  %v4304_v45 = vsel %vm1914_vm5, 1.0, %v4863_v10  ;;  %v3495_v24 = vld [vmem:[%s4904_s20] ss:$12 sps:$4 sm:$0xff]  }
  0xed   : > { %v4307_v46 = vsel %vm1799_vm6, 1.0, %v4863_v10  ;;  %v4310_v47 = vsel %vm1857_vm7, 1.0, %v4863_v10  ;;  %v3456_v48 = vpack.i.bf16 %v4292_v41, %v4287_v39  ;;  %v3451_v49 = vpack.i.bf16 %v4295_v42, %v4298_v43  ;;  %v3500_v25 = vld [vmem:[%s4904_s20 + $0x1c] ss:$12 sps:$4 sm:$0xff]   ;;  %v3505_v27 = vld [vmem:[#allocation9 + $0x4] ss:$12 sps:$4 sm:$0xff]  }
  0xee   : > { %vm1858_vm8 = vcmp.eq.s32.totalorder %v640_v36, 1  ;;  %vm1915_vm9 = vcmp.eq.s32.totalorder %v639_v37, 2  ;;  %v3466_v50 = vpack.i.bf16 %v4301_v44, %v4304_v45  ;;  %v3461_v51 = vpack.i.bf16 %v4310_v47, %v4307_v46  ;;  %v3498_v28 = vld [vmem:[%s4904_s20 + $0x18] ss:$12 sps:$4 sm:$0xff]   ;;  %v627_v29 = vld [vmem:[%s4213_s21] sm:$0xf] }
  0xef   : > { %3437 = vperm.xlu1 %3410, %v3436_v33   ;;  %v4321_v52 = vsel %vm1858_vm8, 1.0, %v4863_v10  ;;  %v4324_v53 = vsel %vm1915_vm9, 1.0, %v4863_v10  ;;  %vm1916_vm10 = vcmp.eq.s32.totalorder %v640_v36, 2  ;;  %vm675_vm15 = vcmask 130048   ;;  %v3501_v33 = vld [vmem:[%s4904_s20 + $0x8] ss:$12 sps:$4 sm:$0xff]  }
  0xf0   : > { %3432 = vperm.xlu0 %3409, %v3431_v34   ;;  %v3471_v54 = vpack.i.bf16 %v4324_v53, %v4321_v52  ;;  %v4329_v55 = vsel %vm1916_vm10, 1.0, %v4863_v10  ;;  %vm805_vm0 = vcmask 261120   ;;  %v3503_v34 = vld [vmem:[#allocation9] ss:$12 sps:$4 sm:$0xff]   ;;  %v3508_v36 = vld [vmem:[#allocation9 + $0x1c] ss:$12 sps:$4 sm:$0xff]  }
  0xf1   : > { %v3502_v37 = vld [vmem:[%s4904_s20 + $0x20] ss:$12 sps:$4 sm:$0xff]   ;;  %vm3892_vm1 = vmmov 0   ;;  %v4381_v11 = vld [vmem:[#allocation11 + $0x8] ss:$12 sps:$4 sm:$0xff]   ;;  %s1845_s21 = sld [smem:[#allocation12]] }
  0xf2   : > { %vm2093_vm2 = vcmask 1043456   ;;  %vm2210_vm3 = vcmask 1041409   ;;  %vm2212_vm4 = vcmask 1042434   ;;  %vm2214_vm5 = vcmask 1043459  }
  0xf3   : > { %3447 = vperm.xlu1 %3410, %v3446_v38   ;;  %v3506_v38 = vld [vmem:[#allocation9 + $0x18] ss:$12 sps:$4 sm:$0xff]   ;;  %vm2216_vm6 = vcmask 1044484   ;;  %vm2218_vm7 = vcmask 1045509   ;;  %vm2220_vm8 = vcmask 1046534   ;;  %vm2222_vm9 = vcmask 1047559  }
  0xf4   : > { %3442 = vperm.xlu0 %3409, %v3441_v40   ;;  %v3511_v40 = vld [vmem:[#allocation9 + $0x34] ss:$12 sps:$4 sm:$0xff]   ;;  %vm2225_vm10 = vcmask 31744  }
  0xf7   : > { %3457 = vperm.xlu1 %3410, %v3456_v48   ;;  %v3512_v48 = vld [vmem:[#allocation9 + $0x8] ss:$12 sps:$4 sm:$0xff]  }
  0xf8   : > { %3452 = vperm.xlu0 %3409, %v3451_v49   ;;  %v3509_v49 = vld [vmem:[#allocation9 + $0x30] ss:$12 sps:$4 sm:$0xff]  }
  0xfb   : > { %3467 = vperm.xlu1 %3410, %v3466_v50   ;;  %v3515_v50 = vld [vmem:[#allocation9 + $0x4c] ss:$12 sps:$4 sm:$0xff]  }
  0xfc   : > { %3462 = vperm.xlu0 %3409, %v3461_v51   ;;  %v3516_v51 = vld [vmem:[#allocation9 + $0x20] ss:$12 sps:$4 sm:$0xff]  }
  0xff   : > { %1942 = vperm.xlu1 %3410, %v4329_v55  }
 0x100   : > { %3472 = vperm.xlu0 %3409, %v3471_v54   ;;  %v3513_v54 = vld [vmem:[#allocation9 + $0x48] ss:$12 sps:$4 sm:$0xff]  }
 0x15e   : > { %v651_v61 = vpop.permute.xlu1 %650 }
 0x15f   : > { %v645_v62 = vpop.permute.xlu0 %644  ;;  %vm657_vm11 = vcmp.eq.s32.totalorder %v4333_v60, %v651_v61  ;;  %v3523_v61 = vld [vmem:[#allocation9 + $0x7c] ss:$12 sps:$4 sm:$0xff]  }
 0x160   : > { %vm655_vm12 = vcmp.eq.s32.totalorder %v4333_v60, %v645_v62  ;;  %v3045_v2 = vsel %vm657_vm11, 1.0, %v4863_v10  ;;  %v3524_v62 = vld [vmem:[#allocation9 + $0x50] ss:$12 sps:$4 sm:$0xff]  }
 0x161   : > { %v3043_v3 = vsel %vm655_vm12, 1.0, %v4863_v10 }
 0x162   : > { %v654_v63 = vpop.permute.xlu1 %653 }
 0x163   : > { %v648_v1 = vpop.permute.xlu0 %647  ;;  %vm658_vm13 = vcmp.eq.s32.totalorder %v4333_v60, %v654_v63  ;;  %v3521_v63 = vld [vmem:[#allocation9 + $0x78] ss:$12 sps:$4 sm:$0xff]  }
 0x164   : > { %vm656_vm14 = vcmp.eq.s32.totalorder %v4333_v60, %v648_v1  ;;  %v3046_v4 = vsel %vm658_vm13, 1.0, %v4863_v10  ;;  %v3527_v1 = vld [vmem:[#allocation9 + $0x94] ss:$12 sps:$4 sm:$0xff]  }
 0x165   : > { %v3044_v5 = vsel %vm656_vm14, 1.0, %v4863_v10  ;;  %v668_v6 = vpack.c.bf16 %v3046_v4, %v3045_v2  ;;  %v3528_v2 = vld [vmem:[#allocation9 + $0x68] ss:$12 sps:$4 sm:$0xff]   ;;  %v3531_v4 = vld [vmem:[#allocation9 + $0xac] ss:$12 sps:$4 sm:$0xff]  }
 0x166   : > { %v667_v7 = vpack.c.bf16 %v3044_v5, %v3043_v3  ;;  %v3525_v3 = vld [vmem:[#allocation9 + $0x90] ss:$12 sps:$4 sm:$0xff]   ;;  %v3532_v5 = vld [vmem:[#allocation9 + $0x80] ss:$12 sps:$4 sm:$0xff]   ;;  %v3418_v13 = vpop.permute.xlu1 %3417 }
 0x167   : > { %v3419_v15 = vunpack.i.l.bf16 %v3418_v13 }
 0x168   : > { %3220 = vmatprep.mubr.msk.bf16.mxu1 %vm675_vm15, %v667_v7  ;;  %v3533_v7 = vld [vmem:[#allocation9 + $0x98] ss:$12 sps:$4 sm:$0xff]  }
 0x169   : > { %3221 = vmatmul.mubr.msk.bf16.vlgmr.msra.gmra.mrb[0].mxu1 %vm675_vm15, %v668_v6  ;;  %v3529_v6 = vld [vmem:[#allocation9 + $0xa8] ss:$12 sps:$4 sm:$0xff]  }
 0x16a   : > { %813 = vmatpush1.bf16.msra.mxu1 %v3477_v8  ;;  %844 = vmatprep.mubr.bf16.mxu1 %v3890_v0  ;;  %v3536_v8 = vld [vmem:[#allocation11 + $0x4] ss:$12 sps:$4 sm:$0xff]  }
 0x16b   : > { %814 = vmatprep.subr.bf16.mxu1 %v3485_v9  ;;  %v3537_v9 = vld [vmem:[#allocation9 + $0xb0] ss:$12 sps:$4 sm:$0xff]  }
 0x16e   : > { %815 = vmatpush1.bf16.msra.mxu1 %v3483_v12  ;;  %v3413_v12 = vpop.permute.xlu0 %3412 }
 0x16f   : > { %918 = vmatprep.subr.bf16.mxu1 %v3491_v14 }
 0x172   : > { %v4384_v14 = vpop.permute.xlu0 %3422 }
 0x23c   : > { %v3222_v16 = vpop.f32.mrb[0].mxu1 }
 0x23d   : > { %v716_v17 = vpop.f32.mrb[1].mxu1 }
 0x23e   : > { %v3223_v18 = vpop.f32.mrb[2].mxu1 }
 0x23f   : > { %v732_v19 = vpack.c.bf16 %v3223_v18, %v3222_v16  ;;  %v719_v20 = vpop.f32.mrb[3].mxu1  ;;  %v3414_v16 = vunpack.i.l.bf16 %v3413_v12 }
 0x240   : > { %v731_v22 = vpack.c.bf16 %v719_v20, %v716_v17  ;;  %v3415_v20 = vunpack.i.h.bf16 %v3413_v12 }
 0x242   : > { %3062 = vmatmul.mubr.msk.bf16.vlgmr.msra.gmra.mrb[4].mxu1 %vm805_vm0, %v731_v22  ;;  %3064 = vmatmul.mubr.msk.bf16.vlgmr.msra.gmra.mrb[0].mxu0 %vm805_vm0, %v731_v22 }
 0x243   : > { %919 = vmatpush1.bf16.msra.mxu1 %v3489_v21  ;;  %854 = vmatprep.mubr.bf16.mxu1 %v3890_v0 }
 0x244   : > { %907 = vmatprep.mubr.bf16.mxu0 %v3890_v0  ;;  %920 = vmatprep.subr.bf16.mxu1 %v3494_v23 }
 0x245   : > { %1015 = vmatpush1.bf16.msra.mxu0 %v3495_v24 }
 0x246   : > { %1016 = vmatprep.subr.bf16.mxu0 %v3500_v25 }
 0x247   : > { %921 = vmatpush1.bf16.msra.mxu1 %v3492_v26 }
 0x248   : > { %1431 = vmatprep.subr.bf16.mxu1 %v3505_v27 }
 0x249   : > { %1017 = vmatpush1.bf16.msra.mxu0 %v3498_v28 }
 0x24a   : > { %3063 = vmatmul.mubr.msk.bf16.gmra.mrb[8].mxu1 %vm805_vm0, %v732_v19  ;;  %3065 = vmatmul.mubr.msk.bf16.gmra.mrb[4].mxu0 %vm805_vm0, %v732_v19 }
 0x24b   : > { %950 = vmatprep.mubr.bf16.mxu1 %v3890_v0  ;;  %1046 = vmatprep.mubr.bf16.mxu0 %v3890_v0 }
 0x24c   : > { %3224 = vmatprep.subr.bf16.mxu0 %v4863_v10 }
 0x252   : > { %3066 = vmatmul.mubr.msk.bf16.vlgmr.msra.gmra.mrb[12].mxu1 %vm805_vm0, %v731_v22  ;;  %3074 = vmatmul.mubr.msk.bf16.vlgmr.msra.gmra.mrb[8].mxu0 %vm805_vm0, %v627_v29 }
 0x253   : > { %3225 = vmatpush3.bf16.msra.mxu0 %v3501_v33  ;;  %960 = vmatprep.mubr.bf16.mxu1 %v3890_v0 }
 0x254   : > { %3226 = vmatprep.subr.bf16.mxu0 %v4863_v10  ;;  %3228 = vmatprep.mubr.msk.bf16.mxu0 %vm3892_vm1, %v4863_v10 }
 0x255   : > { %1432 = vmatpush1.bf16.msra.mxu1 %v3503_v34 }
 0x256   : > { %1433 = vmatprep.subr.bf16.mxu1 %v3508_v36 }
 0x257   : > { %3227 = vmatpush3.bf16.msra.mxu0 %v3502_v37 }
 0x258   : > { %3232 = vmatprep.subr.bf16.mxu0 %v3512_v48 }
 0x259   : > { %1434 = vmatpush1.bf16.msra.mxu1 %v3506_v38  ;;  %v3428_v38 = vpop.permute.xlu1 %3427 }
 0x25a   : > { %3067 = vmatmul.mubr.msk.bf16.gmra.mrb[16].mxu1 %vm805_vm0, %v732_v19  ;;  %3229 = vmatmul.mubr.msk.bf16.vlgmr.msra.gmra.mrb[12].mxu0 %vm805_vm0, %v627_v29  ;;  %v3420_v19 = vunpack.i.h.bf16 %v3418_v13 }
 0x25b   : > { %1463 = vmatprep.mubr.bf16.mxu1 %v3890_v0  ;;  %1435 = vmatprep.subr.bf16.mxu1 %v3511_v40  ;;  %v3433_v40 = vpop.permute.xlu0 %3432 }
 0x25c   : > { %3233 = vmatpush3.bf16.msra.mxu0 %v3512_v48 }
 0x25d   : > { %1436 = vmatpush1.bf16.msra.mxu1 %v3509_v49  ;;  %3234 = vmatprep.subr.bf16.mxu0 %v3516_v51 }
 0x25e   : > { %1437 = vmatprep.subr.bf16.mxu1 %v3515_v50 }
 0x260   : > { %3235 = vmatpush3.bf16.msra.mxu0 %v3516_v51 }
 0x261   : > { %1438 = vmatpush1.bf16.msra.mxu1 %v3513_v54  ;;  %3236 = vmatprep.subr.bf16.mxu0 %v3520_v57 }
 0x262   : > { %1439 = vmatprep.subr.bf16.mxu1 %v3519_v56  ;;  %v3429_v56 = vunpack.i.l.bf16 %v3428_v38 }
 0x264   : > { %3237 = vmatpush3.bf16.msra.mxu0 %v3520_v57  ;;  %v3434_v57 = vunpack.i.l.bf16 %v3433_v40 }
 0x265   : > { %1440 = vmatpush1.bf16.msra.mxu1 %v3517_v58  ;;  %3238 = vmatprep.subr.bf16.mxu0 %v3524_v62 }
 0x266   : > { %1441 = vmatprep.subr.bf16.mxu1 %v3523_v61 }
 0x268   : > { %3239 = vmatpush3.bf16.msra.mxu0 %v3524_v62  ;;  %v3430_v62 = vunpack.i.h.bf16 %v3428_v38 }
 0x269   : > { %1442 = vmatpush1.bf16.msra.mxu1 %v3521_v63  ;;  %3240 = vmatprep.subr.bf16.mxu0 %v3528_v2  ;;  %v3435_v63 = vunpack.i.h.bf16 %v3433_v40 }
 0x26a   : > { %1443 = vmatprep.subr.bf16.mxu1 %v3527_v1 }
 0x26c   : > { %3241 = vmatpush3.bf16.msra.mxu0 %v3528_v2 }
 0x26d   : > { %1444 = vmatpush1.bf16.msra.mxu1 %v3525_v3  ;;  %3242 = vmatprep.subr.bf16.mxu0 %v3532_v5 }
 0x26e   : > { %1445 = vmatprep.subr.bf16.mxu1 %v3531_v4 }
 0x270   : > { %3243 = vmatpush3.bf16.msra.mxu0 %v3532_v5 }
 0x271   : > { %1446 = vmatpush1.bf16.msra.mxu1 %v3529_v6  ;;  %3244 = vmatprep.subr.bf16.mxu0 %v3533_v7 }
 0x272   : > { %1695 = vmatprep.subr.bf16.mxu1 %v3536_v8 }
 0x274   : > { %3245 = vmatpush3.bf16.msra.mxu0 %v3533_v7 }
 0x275   : > { %3246 = vmatprep.subr.bf16.mxu0 %v3537_v9 }
 0x278   : > { %3247 = vmatpush3.bf16.msra.mxu0 %v3537_v9 }
 0x279   : > { %3252 = vmatprep.subr.bf16.mxu0 %v4381_v11 }
 0x315   : > { %v846_v17 = vpop.f32.mrb[4].mxu1  ;;  %v899_v18 = vpop.f32.mrb[0].mxu0 }
 0x316   : > { %v1130_v21 = vmul.f32 %v3414_v16, %v846_v17  ;;  %v1188_v22 = vmul.f32 %v3419_v15, %v899_v18  ;;  %v848_v23 = vpop.f32.mrb[5].mxu1  ;;  %v901_v24 = vpop.f32.mrb[1].mxu0 }
 0x317   : > { %v1131_v25 = vmul.f32 %v3414_v16, %v848_v23  ;;  %v1189_v26 = vmul.f32 %v3419_v15, %v901_v24  ;;  %v850_v27 = vpop.f32.mrb[6].mxu1  ;;  %v903_v28 = vpop.f32.mrb[2].mxu0  ;;  %v3424_v24 = vunpack.i.l.bf16 %v4384_v14 }
 0x318   : > { %v1196_v29 = vadd.f32 %v1188_v22, %v1130_v21  ;;  %v1132_v33 = vmul.f32 %v3415_v20, %v850_v27  ;;  %v1190_v34 = vmul.f32 %v3420_v19, %v903_v28  ;;  %v852_v36 = vpop.f32.mrb[7].mxu1  ;;  %v905_v37 = vpop.f32.mrb[3].mxu0 }
 0x319   : > { %v1197_v48 = vadd.f32 %v1189_v26, %v1131_v25  ;;  %v1133_v49 = vmul.f32 %v3415_v20, %v852_v36  ;;  %v1191_v50 = vmul.f32 %v3420_v19, %v905_v37  ;;  %v4386_v17 = vpop.permute.xlu0 %3442  ;;  %v3438_v22 = vpop.permute.xlu1 %3437 }
 0x31a   : > { %v1198_v51 = vadd.f32 %v1190_v34, %v1132_v33  ;;  %v4862_v25 = vunpack.i.l.bf16 %v4386_v17  ;;  %v4861_v26 = vunpack.i.h.bf16 %v4386_v17  ;;  %v3425_v33 = vunpack.i.h.bf16 %v4384_v14 }
 0x31b   : > { %v1199_v54 = vadd.f32 %v1191_v50, %v1133_v49 }
 0x31d   : > { %v856_v58 = vpop.f32.mrb[8].mxu1  ;;  %v909_v61 = vpop.f32.mrb[4].mxu0 }
 0x31e   : > { %v1134_v1 = vmul.f32 %v3429_v56, %v856_v58  ;;  %v1192_v2 = vmul.f32 %v3434_v57, %v909_v61  ;;  %v858_v3 = vpop.f32.mrb[9].mxu1  ;;  %v911_v4 = vpop.f32.mrb[5].mxu0 }
 0x31f   : > { %v1135_v5 = vmul.f32 %v3429_v56, %v858_v3  ;;  %v1193_v6 = vmul.f32 %v3434_v57, %v911_v4  ;;  %v860_v7 = vpop.f32.mrb[10].mxu1  ;;  %v913_v8 = vpop.f32.mrb[6].mxu0 }
 0x320   : > { %v1200_v9 = vadd.f32 %v1192_v2, %v1134_v1  ;;  %v1136_v12 = vmul.f32 %v3430_v62, %v860_v7  ;;  %v1194_v13 = vmul.f32 %v3435_v63, %v913_v8  ;;  %v862_v15 = vpop.f32.mrb[11].mxu1  ;;  %v915_v16 = vpop.f32.mrb[7].mxu0 }
 0x321   : > { %v1201_v18 = vadd.f32 %v1193_v6, %v1135_v5  ;;  %v1137_v19 = vmul.f32 %v3430_v62, %v862_v15  ;;  %v1195_v20 = vmul.f32 %v3435_v63, %v915_v16  ;;  %v4396_v63 = vpop.permute.xlu1 %3447  ;;  %v3534_v5 = vld [vmem:[#allocation11] ss:$12 sps:$4 sm:$0xff]   ;;  %v3439_v6 = vunpack.i.l.bf16 %v3438_v22 }
 0x322   : > { %v1202_v21 = vadd.f32 %v1194_v13, %v1136_v12  ;;  %v4860_v7 = vunpack.i.l.bf16 %v4396_v63  ;;  %v3540_v12 = vld [vmem:[#allocation11 + $0x1c] ss:$12 sps:$4 sm:$0xff]  }
 0x323   : > { %v1203_v23 = vadd.f32 %v1195_v20, %v1137_v19 }
 0x325   : > { %v952_v27 = vpop.f32.mrb[12].mxu1  ;;  %v1048_v28 = vpop.f32.mrb[8].mxu0 }
 0x326   : > { %v1246_v34 = vmul.f32 %v3424_v24, %v952_v27  ;;  %v1151_v36 = vmul.f32 %v4862_v25, %v1048_v28  ;;  %v954_v37 = vpop.f32.mrb[13].mxu1  ;;  %v1050_v38 = vpop.f32.mrb[9].mxu0  ;;  %v3538_v27 = vld [vmem:[#allocation11 + $0x18] ss:$12 sps:$4 sm:$0xff]  }
 0x327   : > { %v1247_v40 = vmul.f32 %v3424_v24, %v954_v37  ;;  %v1209_v49 = vmul.f32 %v4861_v26, %v1050_v38  ;;  %v956_v50 = vpop.f32.mrb[14].mxu1  ;;  %v1052_v56 = vpop.f32.mrb[10].mxu0  ;;  %v3543_v37 = vld [vmem:[#allocation11 + $0x34] ss:$12 sps:$4 sm:$0xff]  }
 0x328   : > { %v1254_v57 = vadd.f32 %v1246_v34, %v1196_v29  ;;  %v1248_v58 = vmul.f32 %v3425_v33, %v956_v50  ;;  %v958_v61 = vpop.f32.mrb[15].mxu1  ;;  %v1053_v62 = vpop.f32.mrb[11].mxu0  ;;  %v3440_v29 = vunpack.i.h.bf16 %v3438_v22 }
 0x329   : > { %v1255_v1 = vadd.f32 %v1247_v40, %v1197_v48  ;;  %v1210_v14 = vadd.f32 %v1209_v49, %v1151_v36  ;;  %v1249_v2 = vmul.f32 %v3425_v33, %v958_v61  ;;  %v3547_v61 = vld [vmem:[#allocation11 + $0x4c] ss:$12 sps:$4 sm:$0xff]  }
 0x32a   : > { %v1256_v3 = vadd.f32 %v1248_v58, %v1198_v51  ;;  %v3548_v62 = vld [vmem:[#allocation11 + $0x20] ss:$12 sps:$4 sm:$0xff]  }
 0x32b   : > { %v1257_v4 = vadd.f32 %v1249_v2, %v1199_v54  ;;  %v3556_v2 = vld [vmem:[#allocation11 + $0x50] ss:$12 sps:$4 sm:$0xff]  }
 0x32c   : > { %v1269_v8 = vpack.c.bf16 %v1256_v3, %v1254_v57  ;;  %v3541_v57 = vld [vmem:[#allocation11 + $0x30] ss:$12 sps:$4 sm:$0xff]   ;;  %v3553_v3 = vld [vmem:[#allocation11 + $0x78] ss:$12 sps:$4 sm:$0xff]  }
 0x32d   : > { %v962_v13 = vpop.f32.mrb[16].mxu1  ;;  %v1089_v15 = vpop.f32.mrb[12].mxu0  ;;  %v4399_v16 = vpack.c.bf16 %v1257_v4, %v1255_v1  ;;  %v3560_v4 = vld [vmem:[#allocation11 + $0x68] ss:$12 sps:$4 sm:$0xff]  }
 0x32e   : > { %v1250_v19 = vmul.f32 %v3439_v6, %v962_v13  ;;  %v1267_v20 = vmul.f32 %v4860_v7, %v1089_v15  ;;  %v964_v48 = vpop.f32.mrb[17].mxu1  ;;  %1464 = vmatmul.mubr.bf16.vlgmr.msra.gmra.mrb[20].mxu1 %v1269_v8  ;;  %3248 = vmatprep.mubr.bf16.mxu0 %v1269_v8  ;;  %v3230_v51 = vpop.f32.mrb[13].mxu0  ;;  %v3564_v8 = vld [vmem:[#allocation11 + $0x80] ss:$12 sps:$4 sm:$0xff]   ;;  %v3565_v13 = vld [vmem:[#allocation11 + $0x98] ss:$12 sps:$4 sm:$0xff]  }
 0x32f   : > { %v1251_v54 = vmul.f32 %v3439_v6, %v964_v48  ;;  %1696 = vmatpush1.bf16.msra.mxu1 %v3534_v5  ;;  %v966_v24 = vpop.f32.mrb[18].mxu1  ;;  %1473 = vmatprep.mubr.bf16.mxu1 %v3890_v0  ;;  %v1092_v28 = vpop.f32.mrb[14].mxu0  ;;  %v3557_v5 = vld [vmem:[#allocation11 + $0x90] ss:$12 sps:$4 sm:$0xff]   ;;  %v3563_v6 = vld [vmem:[#allocation11 + $0xac] ss:$12 sps:$4 sm:$0xff]  }
 0x330   : > { %v1258_v33 = vadd.f32 %v1250_v19, %v1200_v9  ;;  %v4404_v34 = vadd.f32 %v1267_v20, %v1210_v14  ;;  %v1252_v36 = vmul.f32 %v3440_v29, %v966_v24  ;;  %v968_v22 = vpop.f32.mrb[19].mxu1  ;;  %1697 = vmatprep.subr.bf16.mxu1 %v3540_v12  ;;  %v3231_v38 = vpop.f32.mrb[15].mxu0  ;;  %v3545_v9 = vld [vmem:[#allocation11 + $0x48] ss:$12 sps:$4 sm:$0xff]   ;;  %v3552_v14 = vld [vmem:[#allocation11 + $0x38] ss:$12 sps:$4 sm:$0xff]   ;;  %v4417_v19 = vstv %s3147_s23 }
 0x331   : > { %v1259_v40 = vadd.f32 %v1251_v54, %v1201_v18  ;;  %v1253_v49 = vmul.f32 %v3440_v29, %v968_v22  ;;  %v3551_v18 = vld [vmem:[#allocation11 + $0x64] ss:$12 sps:$4 sm:$0xff]   ;;  %v3561_v12 = vld [vmem:[#allocation11 + $0xa8] ss:$12 sps:$4 sm:$0xff]   ;;  %v4415_v29 = vstv %s1845_s21  ;;  %v1905_v20 = vmul.f32 %v4298_v43, %v4417_v19  ;;  %v4429_v28 = vpop.permute.xlu0 %3452 }
 0x332   : > { %v1260_v50 = vadd.f32 %v1252_v36, %v1202_v21  ;;  %v3549_v21 = vld [vmem:[#allocation11 + $0x60] ss:$12 sps:$4 sm:$0xff]   ;;  %v3566_v15 = vld [vmem:[#allocation11 + $0xb0] ss:$12 sps:$4 sm:$0xff]   ;;  %v3893_v51 = vmov 1966171168   ;;  %v3450_v36 = vunpack.i.h.bf16 %v4396_v63  ;;  %v1996_v43 = vcombine.high %v4404_v34, %v4404_v34 }
 0x333   : > { %v1261_v56 = vadd.f32 %v1253_v49, %v1203_v23  ;;  %1698 = vmatpush1.bf16.msra.mxu1 %v3538_v27  ;;  %v3555_v23 = vld [vmem:[#allocation11 + $0x7c] ss:$12 sps:$4 sm:$0xff]   ;;  %v1998_v54 = vunpack.c.l.s4 %v3893_v51  ;;  %v3454_v22 = vunpack.i.l.bf16 %v4429_v28  ;;  %v3455_v38 = vunpack.i.h.bf16 %v4429_v28 }
 0x334   : > { %1699 = vmatprep.subr.bf16.mxu1 %v3543_v37  ;;  %v1270_v58 = vpack.c.bf16 %v1260_v50, %v1258_v33 }
 0x335   : > { %v1534_v1 = vpack.c.bf16 %v1261_v56, %v1259_v40  ;;  %v1999_v24 = vunpack.c.0.s8 %v1998_v54  ;;  %v4438_v37 = vpop.permute.xlu0 %3462 }
 0x336   : > { %1474 = vmatmul.mubr.bf16.gmra.mrb[24].mxu1 %v1270_v58  ;;  %3249 = vmatmul.mubr.bf16.vlgmr.msra.gmra.mrb[16].mxu0 %v1270_v58 }
 0x337   : > { %1700 = vmatpush1.bf16.msra.mxu1 %v3541_v57  ;;  %3253 = vmatpush3.bf16.msra.mxu0 %v4381_v11  ;;  %v3559_v11 = vld [vmem:[#allocation11 + $0x94] ss:$12 sps:$4 sm:$0xff]  }
 0x338   : > { %3268 = vmatprep.mubr.bf16.mxu0 %v4399_v16  ;;  %1701 = vmatprep.subr.bf16.mxu1 %v3547_v61 }
 0x339   : > { %3254 = vmatprep.subr.bf16.mxu0 %v3548_v62  ;;  %1727 = vmatprep.mubr.bf16.mxu1 %v3890_v0 }
 0x33b   : > { %1702 = vmatpush1.bf16.msra.mxu1 %v3545_v9  ;;  %3255 = vmatpush3.bf16.msra.mxu0 %v3548_v62 }
 0x33c   : > { %1703 = vmatprep.subr.bf16.mxu1 %v3551_v18  ;;  %3256 = vmatprep.subr.bf16.mxu0 %v3552_v14 }
 0x33f   : > { %1704 = vmatpush1.bf16.msra.mxu1 %v3549_v21  ;;  %3257 = vmatpush3.bf16.msra.mxu0 %v3552_v14 }
 0x340   : > { %1705 = vmatprep.subr.bf16.mxu1 %v3555_v23  ;;  %3258 = vmatprep.subr.bf16.mxu0 %v3556_v2  ;;  %v4452_v23 = vpop.permute.xlu0 %3472 }
 0x341   : > { %v3475_v51 = vunpack.i.h.bf16 %v4452_v23  ;;  %v4867_v54 = vunpack.i.l.bf16 %v4452_v23 }
 0x343   : > { %1706 = vmatpush1.bf16.msra.mxu1 %v3553_v3  ;;  %3259 = vmatpush3.bf16.msra.mxu0 %v3556_v2 }
 0x344   : > { %1707 = vmatprep.subr.bf16.mxu1 %v3559_v11  ;;  %3260 = vmatprep.subr.bf16.mxu0 %v3560_v4  ;;  %v3464_v11 = vunpack.i.l.bf16 %v4438_v37 }
 0x347   : > { %1708 = vmatpush1.bf16.msra.mxu1 %v3557_v5  ;;  %3261 = vmatpush3.bf16.msra.mxu0 %v3560_v4 }
 0x348   : > { %1709 = vmatprep.subr.bf16.mxu1 %v3563_v6  ;;  %3262 = vmatprep.subr.bf16.mxu0 %v3564_v8 }
 0x34b   : > { %1710 = vmatpush1.bf16.msra.mxu1 %v3561_v12  ;;  %3263 = vmatpush3.bf16.msra.mxu0 %v3564_v8 }
 0x34c   : > { %3264 = vmatprep.subr.bf16.mxu0 %v3565_v13 }
 0x34e   : > { %1728 = vmatmul.mubr.bf16.vlgmr.msra.gmra.mrb[28].mxu1 %v4399_v16  ;;  %v1847_v16 = vmul.f32 %v4280_v35, %v4415_v29  ;;  %v4433_v35 = vpop.permute.xlu1 %3457 }
 0x34f   : > { %3265 = vmatpush3.bf16.msra.mxu0 %v3565_v13  ;;  %1737 = vmatprep.mubr.bf16.mxu1 %v3890_v0  ;;  %v3459_v56 = vunpack.i.l.bf16 %v4433_v35  ;;  %v4868_v8 = vunpack.i.h.bf16 %v4433_v35 }
 0x350   : > { %3266 = vmatprep.subr.bf16.mxu0 %v3566_v15  ;;  %v4423_v48 = vadd.f32 %v1905_v20, %v1847_v16 }
 0x352   : > { %v4450_v14 = vpop.permute.xlu1 %3467 }
 0x353   : > { %3267 = vmatpush3.bf16.msra.mxu0 %v3566_v15  ;;  %v4865_v12 = vunpack.i.h.bf16 %v4450_v14  ;;  %v4866_v13 = vunpack.i.l.bf16 %v4450_v14  ;;  %v3465_v15 = vunpack.i.h.bf16 %v4438_v37 }
 0x354   : > { %3272 = vmatprep.subr.bf16.mxu0 %v4863_v10 }
 0x356   : > { %1738 = vmatmul.mubr.bf16.gmra.mrb[32].mxu1 %v1534_v1  ;;  %3269 = vmatmul.mubr.bf16.vlgmr.msra.gmra.mrb[20].mxu0 %v1534_v1 }
 0x357   : > { %2748 = vmatprep.mubr.bf16.mxu1 %v3890_v0  ;;  %3288 = vmatprep.mubr.msk.bf16.mxu0 %vm3892_vm1, %v4863_v10  ;;  %v4426_v0 = vshrl.u32 %v641_v59, 7 }
 0x359   : > { %v2002_v27 = vsub.s32 %v1999_v24, %v4426_v0  ;;  %v4455_v3 = vsub.s32 0, %v4426_v0 }
 0x35b   : > { %v2003_v33 = vrot.slane %v4404_v34, %v2002_v27  ;;  %v2010_v61 = vrot.slane %v1996_v43, %v2002_v27 }
 0x35d   : > { %v2011_v40 = vcombine.high %v2003_v33, %v2003_v33  ;;  %v2019_v1 = vrot.slane %v2003_v33, %v2002_v27  ;;  %v2026_v5 = vrot.slane %v2010_v61, %v2002_v27  ;;  %v2012_v6 = vcombine.high %v2010_v61, %v2010_v61 }
 0x35f   : > { %v2033_v21 = vrot.slane %v2011_v40, %v2002_v27  ;;  %v2041_v4 = vcombine.high %v2019_v1, %v2019_v1  ;;  %v2042_v7 = vcombine.high %v2026_v5, %v2026_v5  ;;  %v2040_v26 = vrot.slane %v2012_v6, %v2002_v27 }
 0x361   : > { %v2052_v61 = vrot.slane %v2033_v21, %v4455_v3 }
 0x401   : > { %v1465_v59 = vpop.f32.mrb[20].mxu1 }
 0x402   : > { %v1829_v49 = vmul.f32 %v3450_v36, %v1465_v59  ;;  %v1467_v50 = vpop.f32.mrb[21].mxu1  ;;  %v2043_v59 = vcombine.high %v2033_v21, %v2033_v21  ;;  %v2064_v21 = vrot.slane %v2026_v5, %v4455_v3 }
 0x403   : > { %v1887_v57 = vmul.f32 %v3454_v22, %v1467_v50  ;;  %v1469_v58 = vpop.f32.mrb[22].mxu1 }
 0x404   : > { %v1830_v34 = vmul.f32 %v3455_v38, %v1469_v58  ;;  %v1471_v62 = vpop.f32.mrb[23].mxu1  ;;  %v2048_v58 = vrot.slane %v2019_v1, %v4455_v3 }
 0x405   : > { %v1891_v9 = vadd.f32 %v1887_v57, %v1829_v49  ;;  %v1888_v18 = vmul.f32 %v3459_v56, %v1471_v62 }
 0x407   : > { %v1892_v2 = vadd.f32 %v1888_v18, %v1830_v34 }
 0x409   : > { %v1475_v16 = vpop.f32.mrb[24].mxu1  ;;  %v3250_v20 = vpop.f32.mrb[16].mxu0 }
 0x40a   : > { %v1831_v24 = vmul.f32 %v3464_v11, %v1475_v16  ;;  %v1477_v33 = vpop.f32.mrb[25].mxu1  ;;  %v1518_v43 = vpop.f32.mrb[17].mxu0  ;;  %v2056_v16 = vrot.slane %v2041_v4, %v4455_v3  ;;  %v1947_v1 = vmul.f32 %v3475_v51, %v3250_v20 }
 0x40b   : > { %v1889_v40 = vmul.f32 %v3465_v15, %v1477_v33  ;;  %v1945_v49 = vmul.f32 %v4868_v8, %v1518_v43  ;;  %v1479_v50 = vpop.f32.mrb[26].mxu1  ;;  %v3251_v57 = vpop.f32.mrb[18].mxu0 }
 0x40c   : > { %v1832_v34 = vmul.f32 %v4865_v12, %v1479_v50  ;;  %v1481_v62 = vpop.f32.mrb[27].mxu1  ;;  %v1521_v18 = vpop.f32.mrb[19].mxu0  ;;  %v2060_v50 = vrot.slane %v2043_v59, %v4455_v3 }
 0x40d   : > { %v1893_v25 = vadd.f32 %v1889_v40, %v1831_v24  ;;  %v1949_v33 = vadd.f32 %v1945_v49, %v1891_v9  ;;  %v1890_v43 = vmul.f32 %v4867_v54, %v1481_v62  ;;  %v1946_v10 = vmul.f32 %v4866_v13, %v1521_v18  ;;  %v4483_v12 = vpop.permute.xlu1 %1942 }
 0x40e   : > { %v1948_v24 = vmul.f32 %v3251_v57, %v4483_v12  ;;  %v2072_v49 = vrot.slane %v2042_v7, %v4455_v3  ;;  %v2044_v62 = vcombine.high %v2040_v26, %v2040_v26 }
 0x40f   : > { %v1894_v4 = vadd.f32 %v1890_v43, %v1832_v34  ;;  %v1950_v27 = vadd.f32 %v1946_v10, %v1892_v2  ;;  %v2085_v6 = vmul.f32 %v2048_v58, %v1949_v33  ;;  %v1975_v9 = vcombine.high %v1949_v33, %v1949_v33 }
 0x410   : > { %v1951_v40 = vadd.f32 %v1947_v1, %v1893_v25  ;;  %v2068_v34 = vrot.slane %v2040_v26, %v4455_v3  ;;  %v2076_v7 = vrot.slane %v2044_v62, %v4455_v3  ;;  %v1907_v1 = vmul.f32 %v4310_v47, %v4417_v19 }
 0x411   : > { %v2094_v18 = vsel %vm2093_vm2, %v2085_v6, 0.0  ;;  %v2086_v20 = vmul.f32 %v2052_v61, %v1975_v9  ;;  %v2087_v13 = vmul.f32 %v2056_v16, %v1950_v27  ;;  %v1976_v54 = vcombine.high %v1950_v27, %v1950_v27 }
 0x412   : > { %2095 = vadd.xlane.f32.xlu0 %v2094_v18  ;;  %v2089_v5 = vmul.f32 %v2064_v21, %v1951_v40  ;;  %v1952_v59 = vadd.f32 %v1948_v24, %v1894_v4  ;;  %v1977_v8 = vcombine.high %v1951_v40, %v1951_v40  ;;  %v1849_v21 = vmul.f32 %v4307_v46, %v4415_v29 }
 0x413   : > { %v2097_v10 = vsel %vm2093_vm2, %v2086_v20, 0.0  ;;  %v2088_v2 = vmul.f32 %v2060_v50, %v1976_v54  ;;  %v2100_v33 = vsel %vm2093_vm2, %v2087_v13, 0.0  ;;  %v1848_v54 = vmul.f32 %v4295_v42, %v4415_v29 }
 0x414   : > { %2098 = vadd.xlane.f32.xlu1 %v2097_v10  ;;  %v2091_v57 = vmul.f32 %v2072_v49, %v1952_v59  ;;  %v2090_v25 = vmul.f32 %v2068_v34, %v1977_v8  ;;  %v1978_v58 = vcombine.high %v1952_v59, %v1952_v59  ;;  %v2106_v16 = vsel %vm2093_vm2, %v2089_v5, 0.0 }
 0x415   : > { %v2103_v43 = vsel %vm2093_vm2, %v2088_v2, 0.0  ;;  %v1906_v8 = vmul.f32 %v4287_v39, %v4417_v19  ;;  %v1850_v42 = vmul.f32 %v4301_v44, %v4415_v29  ;;  %v1908_v9 = vmul.f32 %v4321_v52, %v4417_v19 }
 0x416   : > { %2101 = vadd.xlane.f32.xlu0 %v2100_v33  ;;  %v2092_v61 = vmul.f32 %v2076_v7, %v1978_v58  ;;  %v2112_v26 = vsel %vm2093_vm2, %v2091_v57, 0.0  ;;  %v2109_v13 = vsel %vm2093_vm2, %v2090_v25, 0.0  ;;  %v1911_v46 = vadd.f32 %v1907_v1, %v1849_v21 }
 0x417   : > { %v1910_v27 = vadd.f32 %v1906_v8, %v1848_v54  ;;  %v1962_v40 = vstv %s3152_s1  ;;  %v1912_v29 = vadd.f32 %v1908_v9, %v1850_v42  ;;  %v4905_v34 = vunpack.i.h.bf16 %v4433_v35  ;;  %s3035_s1 = sshll.u32 %s4210_s7, 3 }
 0x418   : > { %2107 = vadd.xlane.f32.xlu1 %v2106_v16  ;;  %v2115_v4 = vsel %vm2093_vm2, %v2092_v61, 0.0  ;;  %v4906_v57 = vunpack.i.h.bf16 %v4450_v14  ;;  %v4908_v16 = vunpack.i.l.bf16 %v4450_v14  ;;  %v1963_v54 = vmul.f32 %v4292_v41, %v1962_v40 }
 0x419   : > { %v1964_v1 = vmul.f32 %v4304_v45, %v1962_v40  ;;  %v1965_v21 = vmul.f32 %v4324_v53, %v1962_v40 }
 0x41a   : > { %2104 = vadd.xlane.f32.xlu0 %v2103_v43 }
 0x41b   : > { %v1969_v42 = vadd.f32 %v1965_v21, %v1911_v46 }
 0x41c   : > { %2113 = vadd.xlane.f32.xlu1 %v2112_v26 }
 0x41d   : > { %v2124_v46 = vcombine.high %v1969_v42, %v1969_v42 }
 0x41e   : > { %2110 = vadd.xlane.f32.xlu0 %v2109_v13  ;;  %v1967_v13 = vadd.f32 %v1963_v54, %v4423_v48 }
 0x421   : > { %v1729_v50 = vpop.f32.mrb[28].mxu1 }
 0x422   : > { %v1837_v6 = vmul.f32 %v3450_v36, %v1729_v50  ;;  %v1731_v39 = vpop.f32.mrb[29].mxu1  ;;  %2116 = vadd.xlane.f32.xlu0 %v2115_v4  ;;  %v1966_v36 = vmul.f32 %v4329_v55, %v1962_v40  ;;  %v1968_v4 = vadd.f32 %v1964_v1, %v1910_v27 }
 0x423   : > { %v1895_v47 = vmul.f32 %v3454_v22, %v1731_v39  ;;  %v1733_v24 = vpop.f32.mrb[30].mxu1 }
 0x424   : > { %v1838_v49 = vmul.f32 %v3455_v38, %v1733_v24  ;;  %v1735_v62 = vpop.f32.mrb[31].mxu1  ;;  %v1970_v19 = vadd.f32 %v1966_v36, %v1912_v29  ;;  %v2123_v41 = vcombine.high %v1968_v4, %v1968_v4 }
 0x425   : > { %v1899_v18 = vadd.f32 %v1895_v47, %v1837_v6  ;;  %v1896_v20 = vmul.f32 %v3459_v56, %v1735_v62 }
 0x427   : > { %v1900_v44 = vadd.f32 %v1896_v20, %v1838_v49 }
 0x429   : > { %v1739_v5 = vpop.f32.mrb[32].mxu1  ;;  %v3270_v52 = vpop.f32.mrb[20].mxu0 }
 0x42a   : > { %v1839_v22 = vmul.f32 %v3464_v11, %v1739_v5  ;;  %v1955_v59 = vmul.f32 %v3475_v51, %v3270_v52  ;;  %v1741_v28 = vpop.f32.mrb[33].mxu1  ;;  %v1782_v38 = vpop.f32.mrb[21].mxu0  ;;  %v4907_v51 = vunpack.i.l.bf16 %v4452_v23  ;;  %v2122_v23 = vcombine.high %v1967_v13, %v1967_v13 }
 0x42b   : > { %v1897_v55 = vmul.f32 %v3465_v15, %v1741_v28  ;;  %v1953_v10 = vmul.f32 %v4905_v34, %v1782_v38  ;;  %v1743_v56 = vpop.f32.mrb[34].mxu1  ;;  %v3271_v2 = vpop.f32.mrb[22].mxu0  ;;  %v2125_v5 = vcombine.high %v1970_v19, %v1970_v19 }
 0x42c   : > { %v1840_v25 = vmul.f32 %v4906_v57, %v1743_v56  ;;  %v1745_v58 = vpop.f32.mrb[35].mxu1  ;;  %v1785_v7 = vpop.f32.mrb[23].mxu0  ;;  %v1956_v15 = vmul.f32 %v3271_v2, %v4483_v12 }
 0x42d   : > { %v1901_v33 = vadd.f32 %v1897_v55, %v1839_v22  ;;  %v4528_v11 = vadd.f32 %v1953_v10, %v1899_v18  ;;  %v1898_v61 = vmul.f32 %v4907_v51, %v1745_v58  ;;  %v1954_v37 = vmul.f32 %v4908_v16, %v1785_v7 }
 0x42e   : > { %v4571_v55 = vsub.s32 %v4333_v60, %v4426_v0 }
 0x42f   : > { %v1902_v35 = vadd.f32 %v1898_v61, %v1840_v25  ;;  %v4535_v43 = vadd.f32 %v1954_v37, %v1900_v44  ;;  %v4537_v26 = vadd.f32 %v1955_v59, %v1901_v33 }
 0x431   : > { %v4539_v8 = vadd.f32 %v1956_v15, %v1902_v35 }
 0x49f   : > { %v2096_v14 = vpop.xlane.xlu0 %2095 }
 0x4a0   : > { %v2130_v50 = vmul.f32 %v2096_v14, %v1967_v13 }
 0x4a1   : > { %v2099_v12 = vpop.xlane.xlu1 %2098 }
 0x4a2   : > { %v4545_v6 = vmul.f32 0.17677669, %v2130_v50  ;;  %v2131_v39 = vmul.f32 %v2122_v23, %v2099_v12  ;;  %v2236_v50 = vsub.s32 1, %v4426_v0 }
 0x4a3   : > { %v2102_v9 = vpop.xlane.xlu0 %2101 }
 0x4a4   : > { %v4547_v47 = vmul.f32 0.17677669, %v2131_v39  ;;  %v2132_v24 = vmul.f32 %v2102_v9, %v1968_v4  ;;  %2155 = vperm.xlu1 %3410, %v4545_v6   ;;  %v2240_v4 = vsub.s32 2, %v4426_v0  ;;  %v2244_v9 = vsub.s32 3, %v4426_v0 }
 0x4a5   : > { %v2108_v48 = vpop.xlane.xlu1 %2107 }
 0x4a6   : > { %v4550_v45 = vmul.f32 0.17677669, %v2132_v24  ;;  %v2134_v49 = vmul.f32 %v2108_v48, %v1969_v42  ;;  %2158 = vperm.xlu0 %3409, %v4547_v47  }
 0x4a7   : > { %v2105_v53 = vpop.xlane.xlu0 %2104 }
 0x4a8   : > { %v4553_v27 = vmul.f32 0.17677669, %v2134_v49  ;;  %v2133_v40 = vmul.f32 %v2123_v41, %v2105_v53  ;;  %2161 = vperm.xlu1 %3410, %v4550_v45   ;;  %v2248_v53 = vsub.s32 4, %v4426_v0 }
 0x4a9   : > { %v2114_v62 = vpop.xlane.xlu1 %2113 }
 0x4aa   : > { %v4556_v36 = vmul.f32 0.17677669, %v2133_v40  ;;  %v2136_v18 = vmul.f32 %v2114_v62, %v1970_v19  ;;  %2167 = vperm.xlu0 %3409, %v4553_v27  }
 0x4ab   : > { %v2111_v20 = vpop.xlane.xlu0 %2110 }
 0x4ac   : > { %v4559_v44 = vmul.f32 0.17677669, %v2136_v18  ;;  %v2135_v29 = vmul.f32 %v2124_v46, %v2111_v20  ;;  %2164 = vperm.xlu1 %3410, %v4556_v36   ;;  %v2252_v18 = vsub.s32 5, %v4426_v0 }
 0x4ae   : > { %v4562_v52 = vmul.f32 0.17677669, %v2135_v29  ;;  %2173 = vperm.xlu0 %3409, %v4559_v44  }
 0x4af   : > { %v2117_v22 = vpop.xlane.xlu0 %2116 }
 0x4b0   : > { %v2137_v59 = vmul.f32 %v2125_v5, %v2117_v22  ;;  %2170 = vperm.xlu1 %3410, %v4562_v52  }
 0x4b2   : > { %v4566_v28 = vmul.f32 0.17677669, %v2137_v59 }
 0x4b4   : > { %2176 = vperm.xlu1 %3410, %v4566_v28  }
 0x523   : > { %v2156_v38 = vpop.permute.xlu1 %2155 }
 0x524   : > { %v2181_v56 = vrot.slane %v2156_v38, %v4571_v55  ;;  %v2260_v38 = vsub.s32 7, %v4426_v0 }
 0x525   : > { %v2159_v34 = vpop.permute.xlu0 %2158 }
 0x526   : > { %v2185_v19 = vrot.slane %v2159_v34, %v4571_v55 }
 0x527   : > { %v2162_v10 = vpop.permute.xlu1 %2161 }
 0x528   : > { %v2189_v2 = vrot.slane %v2162_v10, %v4571_v55  ;;  %v2211_v57 = vsel %vm2210_vm3, %v2185_v19, %v2181_v56 }
 0x529   : > { %v2168_v25 = vpop.permute.xlu0 %2167 }
 0x52a   : > { %v2213_v60 = vsel %vm2212_vm4, %v2189_v2, %v2211_v57  ;;  %v2197_v51 = vrot.slane %v2168_v25, %v4571_v55 }
 0x52b   : > { %v2165_v58 = vpop.permute.xlu1 %2164 }
 0x52c   : > { %v2193_v7 = vrot.slane %v2165_v58, %v4571_v55 }
 0x52d   : > { %v2174_v16 = vpop.permute.xlu0 %2173 }
 0x52e   : > { %v2215_v33 = vsel %vm2214_vm5, %v2193_v7, %v2213_v60  ;;  %v2205_v54 = vrot.slane %v2174_v16, %v4571_v55 }
 0x52f   : > { %v2171_v61 = vpop.permute.xlu1 %2170  ;;  %v2217_v15 = vsel %vm2216_vm6, %v2197_v51, %v2215_v33 }
 0x530   : > { %v2201_v37 = vrot.slane %v2171_v61, %v4571_v55 }
 0x532   : > { %v2219_v35 = vsel %vm2218_vm7, %v2201_v37, %v2217_v15 }
 0x533   : > { %v2177_v13 = vpop.permute.xlu1 %2176  ;;  %v2221_v23 = vsel %vm2220_vm8, %v2205_v54, %v2219_v35 }
 0x534   : > { %v2209_v1 = vrot.slane %v2177_v13, %v4571_v55 }
 0x536   : > { %v2223_v21 = vsel %vm2222_vm9, %v2209_v1, %v2221_v23 }
 0x537   : > { %v2226_v14 = vsel %vm2225_vm10, %v2223_v21, -inf }
 0x538   : > { %2227 = vmax.xlane.f32.xlu0 %v2226_v14 }
 0x5c5   : > { %v2228_v12 = vpop.xlane.xlu0 %2227 }
 0x5c6   : > { %v2233_v39 = vrot.slane %v2228_v12, %v4455_v3  ;;  %v2237_v42 = vrot.slane %v2228_v12, %v2236_v50  ;;  %v2241_v24 = vrot.slane %v2228_v12, %v2240_v4  ;;  %v2245_v40 = vrot.slane %v2228_v12, %v2244_v9 }
 0x5c7   : > { %v2249_v20 = vrot.slane %v2228_v12, %v2248_v53  ;;  %v2253_v5 = vrot.slane %v2228_v12, %v2252_v18 }
 0x5c8   : > { %v2270_v41 = vsub.f32 %v4545_v6, %v2233_v39  ;;  %v2271_v48 = vsub.f32 %v4547_v47, %v2237_v42  ;;  %v2272_v46 = vsub.f32 %v4550_v45, %v2241_v24  ;;  %v2273_v29 = vsub.f32 %v4556_v36, %v2245_v40 }
 0x5c9   : > { %v2256_v47 = vsub.s32 6, %v4426_v0  ;;  %v2274_v22 = vsub.f32 %v4553_v27, %v2249_v20  ;;  %v2275_v34 = vsub.f32 %v4562_v52, %v2253_v5  ;;  %v2261_v27 = vrot.slane %v2228_v12, %v2260_v38  ;;  %v3573_v0 = vld [vmem:[%s4909_s22 + $0x1c] ss:$12 sps:$4 sm:$0xff]  }
 0x5ca   : > { %v2278_v49 = vmul.f32 1.442695, %v2270_v41  ;;  %v2280_v62 = vmul.f32 1.442695, %v2271_v48  ;;  %v2282_v6 = vmul.f32 1.442695, %v2272_v46  ;;  %v2806_v5 = vstv %s3177_s4 }
 0x5cb   : > { %v2284_v45 = vmul.f32 1.442695, %v2273_v29  ;;  %v2257_v36 = vrot.slane %v2228_v12, %v2256_v47  ;;  %v2286_v19 = vmul.f32 1.442695, %v2274_v22  ;;  %v2288_v2 = vmul.f32 1.442695, %v2275_v34 }
 0x5cc   : > { %3599 = vpow2.f32 %v2278_v49  ;;  %v2277_v25 = vsub.f32 %v4566_v28, %v2261_v27  ;;  %v2807_v22 = vmul.f32 %v4277_v32, %v2806_v5  ;;  %s601_s4 = scalar_lea.vmem [#allocation15], %s3035_s1 }
 0x5cd   : > { %3601 = vpow2.f32 %v2280_v62  ;;  %v2276_v56 = vsub.f32 %v4559_v44, %v2257_v36 }
 0x5ce   : > { %3603 = vpow2.f32 %v2282_v6  ;;  %v2292_v7 = vmul.f32 1.442695, %v2277_v25  ;;  %v2800_v6 = vstv %s2799_s16  ;;  %s3180_s16 = sshll.u32 %s3986_s14, 7  ;;  %s3894_s14 = smov [#allocation15]  }
 0x5cf   : > { %3605 = vpow2.f32 %v2284_v45  ;;  %v2290_v52 = vmul.f32 1.442695, %v2276_v56  ;;  %v2801_v45 = vmul.f32 %v4274_v31, %v2800_v6  ;;  %s4794_s29 = scalar_lea.hbm %s4914_s18, %s3180_s16  ;;  %s3793_s6 = sshll.u32 %s3894_s14, 4  ;;  %s3794_s6 = int_to_ptr.vmem [resolvable:$false] %s3793_s6 }
 0x5d0   : > { %3607 = vpow2.f32 %v2286_v19  ;;  %s3795_s21 = scalar_lea.vmem %s3794_s6, 256 }
 0x5d1   : > { %3609 = vpow2.f32 %v2288_v2  ;;  %v2808_v36 = vadd.f32 %v2807_v22, %v2801_v45 }
 0x5d2   : > { %3611 = vpow2.f32 %v2290_v52 }
 0x5d3   : > { %3613 = vpow2.f32 %v2292_v7 }
 0x5d6   : > { %v4611_v59 = vpop.eup %3599 }
 0x5d7   : > { %2303 = vperm.xlu1 %3410, %v4611_v59   ;;  %v4618_v10 = vpop.eup %3601 }
 0x5d8   : > { %v4624_v57 = vpop.eup %3603 }
 0x5d9   : > { %v4628_v58 = vpop.eup %3605 }
 0x5da   : > { %v3608_v60 = vpop.eup %3607 }
 0x5db   : > { %2306 = vperm.xlu1 %3410, %v4618_v10   ;;  %v3610_v44 = vpop.eup %3609 }
 0x5dc   : > { %v4631_v33 = vpop.eup %3611 }
 0x5dd   : > { %v4634_v51 = vpop.eup %3613 }
 0x5df   : > { %2309 = vperm.xlu1 %3410, %v4624_v57  }
 0x5e3   : > { %2312 = vperm.xlu1 %3410, %v4628_v58  }
 0x5e7   : > { %2315 = vperm.xlu1 %3410, %v3608_v60  }
 0x5eb   : > { %2318 = vperm.xlu1 %3410, %v3610_v44  }
 0x5ef   : > { %2321 = vperm.xlu1 %3410, %v4631_v33  }
 0x5f3   : > { %2324 = vperm.xlu1 %3410, %v4634_v51  }
 0x656   : > { %v2304_v28 = vpop.permute.xlu1 %2303 }
 0x657   : > { %v2329_v1 = vrot.slane %v2304_v28, %v4571_v55 }
 0x65a   : > { %v2307_v61 = vpop.permute.xlu1 %2306 }
 0x65b   : > { %v2333_v54 = vrot.slane %v2307_v61, %v4571_v55  ;;  %v3578_v61 = vld [vmem:[%s4909_s22 + $0x38] ss:$12 sps:$4 sm:$0xff]  }
 0x65d   : > { %v2358_v12 = vsel %vm2210_vm3, %v2333_v54, %v2329_v1  ;;  %v3583_v54 = vld [vmem:[%s4909_s22 + $0x60] ss:$12 sps:$4 sm:$0xff]   ;;  %v3589_v1 = vld [vmem:[%s4909_s22 + $0x7c] ss:$12 sps:$4 sm:$0xff]  }
 0x65e   : > { %v2310_v16 = vpop.permute.xlu1 %2309 }
 0x65f   : > { %v2337_v13 = vrot.slane %v2310_v16, %v4571_v55  ;;  %v3581_v16 = vld [vmem:[%s4909_s22 + $0x4c] ss:$12 sps:$4 sm:$0xff]  }
 0x661   : > { %v2359_v42 = vsel %vm2212_vm4, %v2337_v13, %v2358_v12  ;;  %v3586_v13 = vld [vmem:[%s4909_s22 + $0x68] ss:$12 sps:$4 sm:$0xff]   ;;  %v3591_v12 = vld [vmem:[%s4909_s22 + $0x90] ss:$12 sps:$4 sm:$0xff]  }
 0x662   : > { %v2313_v37 = vpop.permute.xlu1 %2312 }
 0x663   : > { %v2341_v23 = vrot.slane %v2313_v37, %v4571_v55  ;;  %v3579_v37 = vld [vmem:[%s4909_s22 + $0x48] ss:$12 sps:$4 sm:$0xff]  }
 0x665   : > { %v2360_v41 = vsel %vm2214_vm5, %v2341_v23, %v2359_v42  ;;  %v3587_v23 = vld [vmem:[%s4909_s22 + $0x78] ss:$12 sps:$4 sm:$0xff]  }
 0x666   : > { %v2316_v15 = vpop.permute.xlu1 %2315  ;;  %v3597_v42 = vld [vmem:[%s4909_s22 + $0xac] ss:$12 sps:$4 sm:$0xff]  }
 0x667   : > { %v2345_v21 = vrot.slane %v2316_v15, %v4571_v55  ;;  %v3582_v15 = vld [vmem:[%s4909_s22 + $0x50] ss:$12 sps:$4 sm:$0xff]  }
 0x669   : > { %v2361_v48 = vsel %vm2216_vm6, %v2345_v21, %v2360_v41  ;;  %v3590_v21 = vld [vmem:[%s4909_s22 + $0x80] ss:$12 sps:$4 sm:$0xff]   ;;  %v3598_v41 = vld [vmem:[%s4909_s22 + $0xb0] ss:$12 sps:$4 sm:$0xff]  }
 0x66a   : > { %v2319_v35 = vpop.permute.xlu1 %2318 }
 0x66b   : > { %v2349_v39 = vrot.slane %v2319_v35, %v4571_v55  ;;  %v3585_v35 = vld [vmem:[%s4909_s22 + $0x64] ss:$12 sps:$4 sm:$0xff]  }
 0x66d   : > { %v2362_v40 = vsel %vm2218_vm7, %v2349_v39, %v2361_v48  ;;  %v3594_v39 = vld [vmem:[%s4909_s22 + $0x98] ss:$12 sps:$4 sm:$0xff]   ;;  %v1987_v48 = vcombine.high %v4528_v11, %v4528_v11 }
 0x66e   : > { %v2322_v14 = vpop.permute.xlu1 %2321 }
 0x66f   : > { %v2353_v24 = vrot.slane %v2322_v14, %v4571_v55  ;;  %v3593_v14 = vld [vmem:[%s4909_s22 + $0x94] ss:$12 sps:$4 sm:$0xff]  }
 0x671   : > { %v2363_v62 = vsel %vm2220_vm8, %v2353_v24, %v2362_v40  ;;  %v3595_v24 = vld [vmem:[%s4909_s22 + $0xa8] ss:$12 sps:$4 sm:$0xff]  }
 0x672   : > { %v2325_v49 = vpop.permute.xlu1 %2324 }
 0x673   : > { %v2357_v46 = vrot.slane %v2325_v49, %v4571_v55  ;;  %v2812_v55 = vstv %s3178_s30  ;;  %s2836_s30 = sshll.u32 %s601_s4, 4  ;;  %s4796_s30 = int_to_ptr.vmem [resolvable:$true] %s2836_s30 }
 0x674   : > { %v2813_v2 = vmul.f32 %v4271_v30, %v2812_v55  ;;  %s3789_s15 = scalar_lea.vmem %s4796_s30, 128  ;;  %p3796_p4 = scmp.lt.s32.totalorder %s4796_s30, %s3794_s6 }
 0x675   : > { %v2364_v20 = vsel %vm2222_vm9, %v2357_v46, %v2363_v62  ;;  %p3790_p2 = scmp.ne.s32.totalorder %s4796_s30, %s3789_s15  ;;  %p3797_p10 = scmp.lt.s32.totalorder %s3795_s21, %s3789_s15 }
 0x676   : > { %v2366_v29 = vsel %vm2225_vm10, %v2364_v20, 0.0  ;;  %v2814_v32 = vadd.f32 %v2813_v2, %v2808_v36 }
 0x677   : > { %2367 = vadd.xlane.f32.xlu0 %v2366_v29  ;;  %p3791_p8 = pnand %p3790_p2, %p4915_p12  ;;  %p3798_p1 = por %p3797_p10, %p3796_p4 }
 0x679   : > { %p3792_p5 = pneg %p3791_p8 }
 0x67b   : > { %p3799_p7 = pnand %p3798_p1, %p3792_p5 }
 0x704   : > { %v2368_v34 = vpop.xlane.xlu0 %2367 }
 0x705   : > { %3615 = vrcp.f32 %v2368_v34 }
 0x70f   : > { %v3616_v19 = vpop.eup %3615 }
 0x710   : > { %v2378_v27 = vrot.slane %v3616_v19, %v2236_v50  ;;  %v2374_v56 = vrot.slane %v3616_v19, %v4455_v3  ;;  %v2382_v31 = vrot.slane %v3616_v19, %v2240_v4  ;;  %v2386_v28 = vrot.slane %v3616_v19, %v2244_v9 }
 0x711   : > { %v2390_v30 = vrot.slane %v3616_v19, %v2248_v53  ;;  %v2394_v4 = vrot.slane %v3616_v19, %v2252_v18  ;;  %v3569_v53 = vld [vmem:[%s4909_s22 + $0x4] ss:$12 sps:$4 sm:$0xff]   ;;  %v3567_v18 = vld [vmem:[%s4909_s22] ss:$12 sps:$4 sm:$0xff]  }
 0x712   : > { %v2412_v25 = vmul.f32 %v4618_v10, %v2378_v27  ;;  %v2411_v52 = vmul.f32 %v4611_v59, %v2374_v56  ;;  %v2413_v7 = vmul.f32 %v4624_v57, %v2382_v31  ;;  %v2414_v3 = vmul.f32 %v4628_v58, %v2386_v28  ;;  %v3570_v58 = vld [vmem:[%s4909_s22 + $0x8] ss:$12 sps:$4 sm:$0xff]   ;;  %2716 = vmatprep.subr.bf16.mxu1 %v3569_v53 }
 0x713   : > { %v2415_v50 = vmul.f32 %v3608_v60, %v2390_v30  ;;  %v2416_v59 = vmul.f32 %v3610_v44, %v2394_v4  ;;  %v2398_v10 = vrot.slane %v3616_v19, %v2256_v47  ;;  %v2402_v57 = vrot.slane %v3616_v19, %v2260_v38  ;;  %2717 = vmatpush1.bf16.msra.mxu1 %v3567_v18  ;;  %v3571_v60 = vld [vmem:[%s4909_s22 + $0x18] ss:$12 sps:$4 sm:$0xff]   ;;  %v3574_v44 = vld [vmem:[%s4909_s22 + $0x20] ss:$12 sps:$4 sm:$0xff]  }
 0x714   : > { %2426 = vperm.xlu0 %3409, %v2412_v25   ;;  %2421 = vperm.xlu1 %3410, %v2411_v52   ;;  %v4910_v38 = vmov 0.0   ;;  %v1988_v19 = vcombine.high %v4535_v43, %v4535_v43  ;;  %v1989_v18 = vcombine.high %v4537_v26, %v4537_v26 }
 0x715   : > { %v2417_v9 = vmul.f32 %v4631_v33, %v2398_v10  ;;  %v2418_v47 = vmul.f32 %v4634_v51, %v2402_v57  ;;  %3273 = vmatpush3.bf16.msra.mxu0 %v3570_v58  ;;  %2718 = vmatprep.subr.bf16.mxu1 %v3573_v0  ;;  %v3577_v33 = vld [vmem:[%s4909_s22 + $0x34] ss:$12 sps:$4 sm:$0xff]   ;;  %v3575_v51 = vld [vmem:[%s4909_s22 + $0x30] ss:$12 sps:$4 sm:$0xff]  }
 0x716   : > { %3274 = vmatprep.subr.bf16.mxu0 %v4910_v38 }
 0x717   : > { %2719 = vmatpush1.bf16.msra.mxu1 %v3571_v60 }
 0x718   : > { %2817 = vperm.xlu0 %3409, %v2814_v32   ;;  %2431 = vperm.xlu1 %3410, %v2413_v7  }
 0x719   : > { %3275 = vmatpush3.bf16.msra.mxu0 %v3574_v44  ;;  %2720 = vmatprep.subr.bf16.mxu1 %v3577_v33 }
 0x71a   : > { %3276 = vmatprep.subr.bf16.mxu0 %v4910_v38 }
 0x71b   : > { %2721 = vmatpush1.bf16.msra.mxu1 %v3575_v51 }
 0x71c   : > { %2436 = vperm.xlu1 %3410, %v2414_v3   ;;  %2722 = vmatprep.subr.bf16.mxu1 %v3581_v16 }
 0x71d   : > { %3277 = vmatpush3.bf16.msra.mxu0 %v3578_v61 }
 0x71e   : > { %3278 = vmatprep.subr.bf16.mxu0 %v4910_v38 }
 0x71f   : > { %2723 = vmatpush1.bf16.msra.mxu1 %v3579_v37 }
 0x720   : > { %2441 = vperm.xlu1 %3410, %v2415_v50   ;;  %2724 = vmatprep.subr.bf16.mxu1 %v3585_v35 }
 0x721   : > { %3279 = vmatpush3.bf16.msra.mxu0 %v3582_v15 }
 0x722   : > { %3280 = vmatprep.subr.bf16.mxu0 %v4910_v38 }
 0x723   : > { %2725 = vmatpush1.bf16.msra.mxu1 %v3583_v54 }
 0x724   : > { %2446 = vperm.xlu1 %3410, %v2416_v59   ;;  %2726 = vmatprep.subr.bf16.mxu1 %v3589_v1 }
 0x725   : > { %3281 = vmatpush3.bf16.msra.mxu0 %v3586_v13 }
 0x726   : > { %3282 = vmatprep.subr.bf16.mxu0 %v4910_v38 }
 0x727   : > { %2727 = vmatpush1.bf16.msra.mxu1 %v3587_v23 }
 0x728   : > { %2451 = vperm.xlu1 %3410, %v2417_v9   ;;  %2728 = vmatprep.subr.bf16.mxu1 %v3593_v14 }
 0x729   : > { %3283 = vmatpush3.bf16.msra.mxu0 %v3590_v21 }
 0x72a   : > { %3284 = vmatprep.subr.bf16.mxu0 %v4910_v38 }
 0x72b   : > { %2729 = vmatpush1.bf16.msra.mxu1 %v3591_v12 }
 0x72c   : > { %2456 = vperm.xlu1 %3410, %v2418_v47   ;;  %2730 = vmatprep.subr.bf16.mxu1 %v3597_v42 }
 0x72d   : > { %3285 = vmatpush3.bf16.msra.mxu0 %v3594_v39 }
 0x72e   : > { %3286 = vmatprep.subr.bf16.mxu0 %v4910_v38 }
 0x72f   : > { %2731 = vmatpush1.bf16.msra.mxu1 %v3595_v24 }
 0x731   : > { %3287 = vmatpush3.bf16.msra.mxu0 %v3598_v41 }
 0x793   : > { %v2427_v49 = vpop.permute.xlu0 %2426  ;;  %v2422_v40 = vpop.permute.xlu1 %2421 }
 0x794   : > { %v2460_v46 = vmul.f32 %v2427_v49, %v1987_v48  ;;  %v2459_v62 = vmul.f32 %v2422_v40, %v4528_v11  ;;  %v1990_v48 = vcombine.high %v4539_v8, %v4539_v8 }
 0x796   : > { %v2474_v20 = vsel %vm2093_vm2, %v2460_v46, 0.0  ;;  %v2467_v29 = vsel %vm2093_vm2, %v2459_v62, 0.0 }
 0x797   : > { %v2475_v6 = vrot.slane %v2474_v20, 4  ;;  %v2468_v5 = vrot.slane %v2467_v29, 4  ;;  %v2432_v22 = vpop.permute.xlu1 %2431 }
 0x798   : > { %v2461_v45 = vmul.f32 %v2432_v22, %v4535_v43 }
 0x799   : > { %v2476_v36 = vadd.f32 %v2475_v6, %v2474_v20  ;;  %v2469_v34 = vadd.f32 %v2468_v5, %v2467_v29 }
 0x79a   : > { %v2481_v55 = vsel %vm2093_vm2, %v2461_v45, 0.0 }
 0x79b   : > { %v2477_v27 = vrot.slane %v2476_v36, 2  ;;  %v2470_v56 = vrot.slane %v2469_v34, 2  ;;  %v2482_v2 = vrot.slane %v2481_v55, 4  ;;  %v2437_v11 = vpop.permute.xlu1 %2436 }
 0x79c   : > { %v2462_v25 = vmul.f32 %v2437_v11, %v1988_v19 }
 0x79d   : > { %v2478_v52 = vadd.f32 %v2477_v27, %v2476_v36  ;;  %v2471_v31 = vadd.f32 %v2470_v56, %v2469_v34  ;;  %v2483_v32 = vadd.f32 %v2482_v2, %v2481_v55 }
 0x79e   : > { %v2488_v7 = vsel %vm2093_vm2, %v2462_v25, 0.0 }
 0x79f   : > { %v2479_v28 = vrot.slane %v2478_v52, 1  ;;  %v2472_v3 = vrot.slane %v2471_v31, 1  ;;  %v2484_v30 = vrot.slane %v2483_v32, 2  ;;  %v2489_v50 = vrot.slane %v2488_v7, 4  ;;  %v2442_v4 = vpop.permute.xlu1 %2441 }
 0x7a0   : > { %v2463_v59 = vmul.f32 %v2442_v4, %v4537_v26 }
 0x7a1   : > { %v2480_v10 = vadd.f32 %v2479_v28, %v2478_v52  ;;  %v2473_v9 = vadd.f32 %v2472_v3, %v2471_v31  ;;  %v2485_v43 = vadd.f32 %v2484_v30, %v2483_v32  ;;  %v2490_v57 = vadd.f32 %v2489_v50, %v2488_v7 }
 0x7a2   : > { %v2495_v53 = vsel %vm2093_vm2, %v2463_v59, 0.0 }
 0x7a3   : > { %v2524_v58 = vpack.c.bf16 %v2480_v10, %v2480_v10  ;;  %v2523_v47 = vpack.c.bf16 %v2473_v9, %v2473_v9  ;;  %v2486_v0 = vrot.slane %v2485_v43, 1  ;;  %v2491_v38 = vrot.slane %v2490_v57, 2  ;;  %v2447_v60 = vpop.permute.xlu1 %2446 }
 0x7a4   : > { %v2496_v44 = vrot.slane %v2495_v53, 4  ;;  %v2464_v33 = vmul.f32 %v2447_v60, %v1989_v18  ;;  %v4911_v60 = vunpack.i.l.bf16 %v4386_v17 }
 0x7a5   : > { %v2487_v51 = vadd.f32 %v2486_v0, %v2485_v43  ;;  %v2492_v61 = vadd.f32 %v2491_v38, %v2490_v57  ;;  %v2572_v16 = vunpack.c.l.b16 %v2524_v58  ;;  %v2571_v37 = vunpack.c.l.b16 %v2523_v47 }
 0x7a6   : > { %v2497_v15 = vadd.f32 %v2496_v44, %v2495_v53  ;;  %v2502_v35 = vsel %vm2093_vm2, %v2464_v33, 0.0 }
 0x7a7   : > { %v2525_v54 = vpack.c.bf16 %v2487_v51, %v2487_v51  ;;  %v2493_v13 = vrot.slane %v2492_v61, 1  ;;  %v2503_v1 = vrot.slane %v2502_v35, 4  ;;  %v2452_v23 = vpop.permute.xlu1 %2451  ;;  %v2579_v42 = vsel %vm2210_vm3, %v2572_v16, %v2571_v37 }
 0x7a8   : > { %v2498_v21 = vrot.slane %v2497_v15, 2  ;;  %v2465_v26 = vmul.f32 %v2452_v23, %v4539_v8 }
 0x7a9   : > { %v2573_v14 = vunpack.c.l.b16 %v2525_v54  ;;  %v2494_v12 = vadd.f32 %v2493_v13, %v2492_v61  ;;  %v2504_v39 = vadd.f32 %v2503_v1, %v2502_v35  ;;  %v4912_v61 = vunpack.i.h.bf16 %v4386_v17 }
 0x7aa   : > { %v2499_v24 = vadd.f32 %v2498_v21, %v2497_v15  ;;  %v2509_v41 = vsel %vm2093_vm2, %v2465_v26, 0.0  ;;  %v4913_v13 = vunpack.i.l.bf16 %v4396_v63  ;;  %v2818_v26 = vpop.permute.xlu0 %2817 }
 0x7ab   : > { %v2580_v49 = vsel %vm2212_vm4, %v2573_v14, %v2579_v42  ;;  %v2526_v40 = vpack.c.bf16 %v2494_v12, %v2494_v12  ;;  %v2505_v46 = vrot.slane %v2504_v39, 2  ;;  %v2510_v62 = vrot.slane %v2509_v41, 4  ;;  %v2457_v20 = vpop.permute.xlu1 %2456 }
 0x7ac   : > { %v2500_v29 = vrot.slane %v2499_v24, 1  ;;  %v2466_v6 = vmul.f32 %v2457_v20, %v1990_v48 }
 0x7ad   : > { %v2574_v5 = vunpack.c.l.b16 %v2526_v40  ;;  %v2506_v22 = vadd.f32 %v2505_v46, %v2504_v39  ;;  %v2511_v45 = vadd.f32 %v2510_v62, %v2509_v41 }
 0x7ae   : > { %v2501_v36 = vadd.f32 %v2500_v29, %v2499_v24  ;;  %v2516_v34 = vsel %vm2093_vm2, %v2466_v6, 0.0 }
 0x7af   : > { %v2581_v55 = vsel %vm2214_vm5, %v2574_v5, %v2580_v49  ;;  %v2507_v19 = vrot.slane %v2506_v22, 1  ;;  %v2512_v27 = vrot.slane %v2511_v45, 2  ;;  %v2517_v56 = vrot.slane %v2516_v34, 4 }
 0x7b0   : > { %v2527_v8 = vpack.c.bf16 %v2501_v36, %v2501_v36 }
 0x7b1   : > { %v2508_v2 = vadd.f32 %v2507_v19, %v2506_v22  ;;  %v2513_v11 = vadd.f32 %v2512_v27, %v2511_v45  ;;  %v2518_v25 = vadd.f32 %v2517_v56, %v2516_v34 }
 0x7b2   : > { %v2575_v52 = vunpack.c.l.b16 %v2527_v8 }
 0x7b3   : > { %v2528_v31 = vpack.c.bf16 %v2508_v2, %v2508_v2  ;;  %v2514_v32 = vrot.slane %v2513_v11, 1  ;;  %v2519_v7 = vrot.slane %v2518_v25, 2 }
 0x7b4   : > { %v2582_v28 = vsel %vm2216_vm6, %v2575_v52, %v2581_v55 }
 0x7b5   : > { %v2576_v3 = vunpack.c.l.b16 %v2528_v31  ;;  %v2515_v30 = vadd.f32 %v2514_v32, %v2513_v11  ;;  %v2520_v50 = vadd.f32 %v2519_v7, %v2518_v25 }
 0x7b7   : > { %v2583_v4 = vsel %vm2218_vm7, %v2576_v3, %v2582_v28  ;;  %v2529_v59 = vpack.c.bf16 %v2515_v30, %v2515_v30  ;;  %v2521_v10 = vrot.slane %v2520_v50, 1 }
 0x7b9   : > { %v2577_v9 = vunpack.c.l.b16 %v2529_v59  ;;  %v2522_v43 = vadd.f32 %v2521_v10, %v2520_v50 }
 0x7bb   : > { %v2584_v57 = vsel %vm2220_vm8, %v2577_v9, %v2583_v4  ;;  %v2530_v53 = vpack.c.bf16 %v2522_v43, %v2522_v43 }
 0x7bd   : > { %v2578_v18 = vunpack.c.l.b16 %v2530_v53 }
 0x7bf   : > { %v2585_v58 = vsel %vm2222_vm9, %v2578_v18, %v2584_v57 }
 0x7c0   : > { %v2586_v47 = vpack.c.b16 %v2585_v58, %v2585_v58 }
 0x7c2   : > { %2749 = vmatmul.mubr.bf16.vlgmr.msra.gmra.mrb[36].mxu1 %v2586_v47  ;;  %3289 = vmatmul.mubr.bf16.vlgmr.msra.gmra.mrb[24].mxu0 %v2586_v47 }
 0x895   : > { %v2750_v0 = vpop.f32.mrb[36].mxu1  ;;  %v2791_v38 = vpop.f32.mrb[24].mxu0 }
 0x896   : > { %v2797_v44 = vmul.f32 %v4911_v60, %v2750_v0  ;;  %v2752_v33 = vpop.f32.mrb[37].mxu1  ;;  %v3290_v51 = vpop.f32.mrb[25].mxu0  ;;  %v2809_v1 = vmul.f32 %v4913_v13, %v2791_v38 }
 0x897   : > { %v2803_v16 = vmul.f32 %v4912_v61, %v2752_v33  ;;  %v2754_v37 = vpop.f32.mrb[38].mxu1  ;;  %v2794_v15 = vpop.f32.mrb[26].mxu0 }
 0x898   : > { %v2755_v35 = vpop.f32.mrb[39].mxu1  ;;  %v3291_v54 = vpop.f32.mrb[27].mxu0 }
 0x899   : > { %v2804_v23 = vadd.f32 %v2803_v16, %v2797_v44 }
 0x89b   : > { %v2810_v21 = vadd.f32 %v2809_v1, %v2804_v23 }
 0x89d   : > { %v2820_v14 = vmul.f32 %v2818_v26, %v2810_v21 }
 0x89f   : > { %2821 = vst [vmem:[%s601_s4] sm:$0xff] %v2820_v14 }
 0x8a0   : > { %3802 = shalt.err (!%p3799_p7)
}
 0x8a1   : > { %s3803_s7 = scalar_lea.hbm %s4794_s29, 128  ;;  %s3807_s16 = scalar_lea.hbm %s4914_s18, 256 }
 0x8a2   : > { %p3804_p9 = scmp.ne.s32.totalorder %s4794_s29, %s3803_s7  ;;  %p3808_p11 = scmp.lt.u32.totalorder %s4794_s29, %s4914_s18 }
 0x8a3   : > { %p3809_p13 = scmp.lt.u32.totalorder %s3807_s16, %s3803_s7  ;;  %p3811_p2 = scmp.lt.u32.totalorder %s3803_s7, %s4794_s29 }
 0x8a4   : > { %p3805_p3 = pnand %p3804_p9, %p4915_p12 }
 0x8a5   : > { %p3810_p0 = por %p3809_p13, %p3808_p11 }
 0x8a6   : > { %p3806_p6 = pneg %p3805_p3 }
 0x8a7   : > { %p3812_p8 = por %p3811_p2, %p3810_p0 }
 0x8a9   : > { %p3813_p5 = pnand %p3812_p8, %p3806_p6 }
 0x8ab   : > { %3816 = shalt.err (!%p3813_p5)
}
 0x8ac   : > { %3318 = dma.vmem_to_hbm [thread:$0]  (%p4915_p12), %s4796_s30, 128, %s4794_s29, %s2823_s0  }
 0x8ad PF: > { %s2848_s24 = sand.u32 1, %s3863_s25   ;;  %p4916_p4 = scmp.ne.s32.totalorder %s4888_s5, 0 }
 0x8ae   : > { %p4917_p10 = scmp.ge.s32.totalorder %s3875_s28, 2  ;;  %s2849_s15 = scalar_lea.sflag [#allocation4], %s2848_s24 }
 0x8b0   : > { %p3344_p1 = pnand %p4917_p10, %p4916_p4 }
 0x8b2   : > { %3858 = dma.done.wait (!%p3344_p1), %s2849_s15, 128  }
 0x8b3   : > { %3860 = vsyncadd (!%p3344_p1), %s2849_s15, 4294967168  ;;  %p30_p7 = scmp.ge.s32.totalorder %s4128_s19, 4   ;;  %s4918_s25 = smov %s3867_s26 }
 0x8b4   : > { %s4919_s26 = smov %s3871_s27  ;;  %s4920_s27 = smov %s4139_s17 }
 0x8b5   : > { %s4921_s28 = smov %s4128_s19  ;;  %32 = sbr.rel (!%p30_p7) target bundleno = 18 (0x12), region = 155 }
 0x8bc   :  { %2854 = vsyncpa [#allocation3], 1 }
 0x8bd   :  { %2856 = vsyncpa [#allocation3 + $0x1], 1 }
 0x8be   :  { %2857 = vsyncpa [#allocation7], 1 }
 0x8bf   :  { %2859 = vsyncpa [#allocation7 + $0x1], 1 }
 0x8c0   :  { %2860 = vsyncpa [#allocation10], 1 }
 0x8c1   :  { %2861 = vsyncpa [#allocation4], 1 }
 0x8c2   :  { %2863 = vsyncpa [#allocation4 + $0x1], 1 }
 0x8c3   :  { %2864 = vsyncpa [#allocation5], 1 }
 0x8c4   :  { %2866 = vsyncpa [#allocation5 + $0x1], 1 }
 0x8c5   :  { %2867 = vsyncpa [#allocation14], 1 }

</bundles_post_ra>
